<compile_context>
chip_gen: v6e
topology: v6e:2x2x1
jax: 0.10.0
libtpu: 0.0.40
codegen_flags: <defaults>
</compile_context>

<pallas_src>
import functools

import jax
import jax.numpy as jnp
from jax.experimental import pallas as pl
from jax.experimental.pallas import tpu as pltpu


def _pair(x):
    return (x, x) if isinstance(x, int) else tuple(x)


def _round_up(x, m):
    return ((x + m - 1) // m) * m


def _corr_kernel(x1_ref, x2_ref, o_ref, *, taps, patchW, P, dpH, dpW,
                 dilH, dilW, Wc, Lw, store_group, num_groups):
    """One grid step = `store_group` patch displacements for one batch.

    x1_ref: (C, n1) flat x1 canvas (row pitch Wc), zero outside valid region.
    x2_ref: (C, n2) flat padded x2 canvas (row pitch Wc).
    o_ref : (store_group, Lw) lane-dense output rows, one per displacement.
    """
    g = pl.program_id(1)

    def emit_group(grp):
        for r in range(store_group):
            p = grp * store_group + r
            if p >= P:
                # Padding row (P rounded up to store_group); sliced off
                # wrapper-side -- zero it for tidiness.
                o_ref[pl.ds(r, 1), :] = jnp.zeros((1, Lw), o_ref.dtype)
                continue
            ph, pw = divmod(p, patchW)
            acc = None
            for (i, j) in taps:
                s1 = i * dilH * Wc + j * dilW
                s2 = (i * dilH + ph * dpH) * Wc + (j * dilW + pw * dpW)
                # Multiply in the native dtype (bf16 stays bf16 on v6e/v7x
                # VALUs); widen only into the f32 accumulator.  For f32
                # inputs the astype is a no-op.
                prod = (x1_ref[:, pl.ds(s1, Lw)]
                        * x2_ref[:, pl.ds(s2, Lw)]).astype(jnp.float32)
                acc = prod if acc is None else acc + prod
            # One cross-sublane (XLU) channel reduce per displacement, after
            # all kernel taps were accumulated on the VPU.
            row = jnp.sum(acc, axis=0, keepdims=True)
            o_ref[pl.ds(r, 1), :] = row.astype(o_ref.dtype)

    if num_groups == 1:
        emit_group(0)
    else:
        for grp in range(num_groups):
            pl.when(g == grp)(functools.partial(emit_group, grp))


def spatial_correlation_sampler(input1, input2, kernel_size=1, patch_size=1,
                                stride=1, padding=0, dilation=1,
                                dilation_patch=1):
    kH, kW = _pair(kernel_size)
    patchH, patchW = _pair(patch_size)
    padH, padW = _pair(padding)
    dilH, dilW = _pair(dilation)
    dpH, dpW = _pair(dilation_patch)
    dH, dW = _pair(stride)

    B, C, H, W = input1.shape
    assert input2.shape == input1.shape

    # Strided output size (what the op returns) and the stride-1 "full" size
    # the kernel computes (stride applied by subsampling afterwards).
    oH = (H + 2 * padH - dilH * (kH - 1) - 1) // dH + 1
    oW = (W + 2 * padW - dilW * (kW - 1) - 1) // dW + 1
    oH1 = H + 2 * padH - dilH * (kH - 1)
    oW1 = W + 2 * padW - dilW * (kW - 1)

    # Patch-displacement padding for input2 (asymmetric for even patch sizes,
    # matching the CUDA kernel's zero bounds-check behavior).
    radH_lo = dpH * ((patchH - 1) // 2)
    radH_hi = dpH * (patchH - 1 - (patchH - 1) // 2)
    radW_lo = dpW * ((patchW - 1) // 2)
    radW_hi = dpW * (patchW - 1 - (patchW - 1) // 2)

    x1p = jnp.pad(input1, ((0, 0), (0, 0), (padH, padH), (padW, padW)))
    x2p = jnp.pad(input2, ((0, 0), (0, 0),
                           (padH + radH_lo, padH + radH_hi),
                           (padW + radW_lo, padW + radW_hi)))

    H1p, W1p = H + 2 * padH, W + 2 * padW
    H2p = H + 2 * padH + dpH * (patchH - 1)
    Wc = W + 2 * padW + dpW * (patchW - 1)       # shared flat row pitch

    P = patchH * patchW
    Lspan = (oH1 - 1) * Wc + oW1                 # flat span of valid output
    Lw = _round_up(max(Lspan, 1), 128)           # lane-dense slab width

    # Maximum static flat offsets the kernel slices from (per tap/displ.).
    s1_max = dilH * (kH - 1) * Wc + dilW * (kW - 1)
    s2_max = (dilH * (kH - 1) + dpH * (patchH - 1)) * Wc \
        + dilW * (kW - 1) + dpW * (patchW - 1)

    # Flat canvases sharing the row pitch Wc; pad the flat ends so every
    # static in-kernel slice of length Lw stays in bounds, lane-aligned sizes.
    x1c = jnp.pad(x1p, ((0, 0), (0, 0), (0, 0), (0, Wc - W1p)))
    x1f = x1c.reshape(B, C, H1p * Wc)
    x2f = x2p.reshape(B, C, H2p * Wc)
    n1 = _round_up(max(H1p * Wc, s1_max + Lw), 128)
    n2 = _round_up(max(H2p * Wc, s2_max + Lw), 128)
    x1f = jnp.pad(x1f, ((0, 0), (0, 0), (0, n1 - H1p * Wc)))
    x2f = jnp.pad(x2f, ((0, 0), (0, 0), (0, n2 - H2p * Wc)))

    taps = tuple((i, j) for i in range(kH) for j in range(kW))

    out_dtype = input1.dtype
    out_itemsize = jnp.dtype(out_dtype).itemsize
    in_itemsize = jnp.dtype(input1.dtype).itemsize
    # Full packed-vreg store groups: 8 rows for f32, 16 for bf16, 32 for int8.
    store_group = max(8, 32 // out_itemsize)
    P_pad = _round_up(P, store_group)
    num_groups = P_pad // store_group

    kernel = functools.partial(
        _corr_kernel, taps=taps, patchW=patchW, P=P, dpH=dpH, dpW=dpW,
        dilH=dilH, dilW=dilW, Wc=Wc, Lw=Lw, store_group=store_group,
        num_groups=num_groups)

    # Honest VMEM accounting: double-buffered input blocks, double-buffered
    # output block, plus the in-kernel f32 product/accumulator temporaries.
    vmem_need = (2 * C * (n1 + n2) * in_itemsize
                 + 2 * store_group * Lw * out_itemsize
                 + 2 * C * Lw * 4)
    try:
        cap = int(getattr(pltpu.get_tpu_info(), "vmem_capacity_bytes", 0))
    except Exception:
        cap = 0
    if cap <= 0:
        cap = 64 << 20                           # conservative (v7x per-TC)
    vmem_limit = vmem_need + (4 << 20)
    vmem_limit = max(vmem_limit, 16 << 20)
    vmem_limit = int(min(vmem_limit, cap - (2 << 20)))

    out_canvas = pl.pallas_call(
        kernel,
        out_shape=jax.ShapeDtypeStruct((B, P_pad, Lw), out_dtype),
        grid=(B, num_groups),
        in_specs=[
            # Input blocks stay resident across the displacement-group axis
            # (constant block index over g -> no re-DMA).
            pl.BlockSpec((None, C, n1), lambda b, g: (b, 0, 0)),
            pl.BlockSpec((None, C, n2), lambda b, g: (b, 0, 0)),
        ],
        out_specs=pl.BlockSpec((None, store_group, Lw), lambda b, g: (b, g, 0)),
        compiler_params=pltpu.CompilerParams(
            dimension_semantics=("parallel", "parallel"),
            vmem_limit_bytes=vmem_limit),
    )(x1f, x2f)

    # Un-flatten the lane-dense canvas back to (B, patchH, patchW, oH, oW)
    # (pure layout plumbing outside the kernel).
    out_canvas = out_canvas[:, :P]
    need = oH1 * Wc
    if Lw < need:
        out_canvas = jnp.pad(out_canvas, ((0, 0), (0, 0), (0, need - Lw)))
    full = out_canvas[:, :, :need].reshape(B, P, oH1, Wc)[:, :, :, :oW1]
    full = full.reshape(B, patchH, patchW, oH1, oW1)
    return full[:, :, :, ::dH, ::dW]


def correlation_ref(input1, input2, kernel_size=1, patch_size=1, stride=1,
                    padding=0, dilation=1, dilation_patch=1):
    """Pure-JAX reference with the same semantics (for verification)."""
    kH, kW = _pair(kernel_size)
    patchH, patchW = _pair(patch_size)
    padH, padW = _pair(padding)
    dilH, dilW = _pair(dilation)
    dpH, dpW = _pair(dilation_patch)
    dH, dW = _pair(stride)

    B, C, H, W = input1.shape
    oH = (H + 2 * padH - dilH * (kH - 1) - 1) // dH + 1
    oW = (W + 2 * padW - dilW * (kW - 1) - 1) // dW + 1

    radH_lo = dpH * ((patchH - 1) // 2)
    radH_hi = dpH * (patchH - 1 - (patchH - 1) // 2)
    radW_lo = dpW * ((patchW - 1) // 2)
    radW_hi = dpW * (patchW - 1 - (patchW - 1) // 2)

    x1p = jnp.pad(input1, ((0, 0), (0, 0), (padH, padH), (padW, padW)))
    x2p = jnp.pad(input2, ((0, 0), (0, 0),
                           (padH + radH_lo, padH + radH_hi),
                           (padW + radW_lo, padW + radW_hi)))
    x1p = x1p.astype(jnp.float32)
    x2p = x2p.astype(jnp.float32)

    out = jnp.zeros((B, patchH, patchW, oH, oW), jnp.float32)
    for ph in range(patchH):
        for pw in range(patchW):
            acc = jnp.zeros((B, oH, oW), jnp.float32)
            for i in range(kH):
                for j in range(kW):
                    h1, w1 = i * dilH, j * dilW
                    h2, w2 = h1 + ph * dpH, w1 + pw * dpW
                    a = x1p[:, :, h1:h1 + (oH - 1) * dH + 1:dH,
                            w1:w1 + (oW - 1) * dW + 1:dW]
                    b = x2p[:, :, h2:h2 + (oH - 1) * dH + 1:dH,
                            w2:w2 + (oW - 1) * dW + 1:dW]
                    acc = acc + jnp.sum(a * b, axis=1)
            out = out.at[:, ph, pw].set(acc)
    return out.astype(input1.dtype)


class SpatialCorrelationSampler:
    """JAX/Pallas equivalent of the PyTorch SpatialCorrelationSampler module
    (forward only)."""

    def __init__(self, kernel_size=1, patch_size=1, stride=1, padding=0,
                 dilation=1, dilation_patch=1):
        self.kernel_size = kernel_size
        self.patch_size = patch_size
        self.stride = stride
        self.padding = padding
        self.dilation = dilation
        self.dilation_patch = dilation_patch

    def __call__(self, input1, input2):
        return spatial_correlation_sampler(
            input1, input2, self.kernel_size, self.patch_size, self.stride,
            self.padding, self.dilation, self.dilation_patch)


if __name__ == "__main__":
    key = jax.random.PRNGKey(0)
    k1, k2, k3, k4 = jax.random.split(key, 4)

    # Test 1: the colorizer configuration (kernel 1, patch 5, stride 1).
    B, C, H, W = 2, 4, 16, 16
    input1 = jax.random.normal(k1, (B, C, H, W), dtype=jnp.float32)
    input2 = jax.random.normal(k2, (B, C, H, W), dtype=jnp.float32)
    sampler = SpatialCorrelationSampler(kernel_size=1, patch_size=5, stride=1,
                                        padding=0, dilation=1,
                                        dilation_patch=1)
    out = jax.block_until_ready(sampler(input1, input2))
    ref = correlation_ref(input1, input2, kernel_size=1, patch_size=5,
                          stride=1, padding=0, dilation=1, dilation_patch=1)
    assert out.shape == (B, 5, 5, H, W), out.shape
    assert jnp.allclose(out, ref, atol=1e-5, rtol=1e-5), "mismatch (test 1)"

    # Test 2: general path (kernel 3, patch 3, stride 2, padding 1, dp 2).
    B2, C2, H2, W2 = 2, 3, 12, 12
    a2 = jax.random.normal(k3, (B2, C2, H2, W2), dtype=jnp.float32)
    b2 = jax.random.normal(k4, (B2, C2, H2, W2), dtype=jnp.float32)
    sampler2 = SpatialCorrelationSampler(kernel_size=3, patch_size=3, stride=2,
                                         padding=1, dilation=1,
                                         dilation_patch=2)
    out2 = jax.block_until_ready(sampler2(a2, b2))
    ref2 = correlation_ref(a2, b2, kernel_size=3, patch_size=3, stride=2,
                           padding=1, dilation=1, dilation_patch=2)
    assert out2.shape == (B2, 3, 3, 6, 6), out2.shape
    assert jnp.allclose(out2, ref2, atol=1e-4, rtol=1e-4), "mismatch (test 2)"

    print("KERNEL_OK")
</pallas_src>

<mosaic_0001>
module attributes {stable_mosaic.version = 11 : i64} {
  func.func @_corr_kernel(%arg0: i32, %arg1: i32, %arg2: memref<1x4x384xf32, #tpu.memory_space<vmem>>, %arg3: memref<1x4x512xf32, #tpu.memory_space<vmem>>, %arg4: memref<1x8x384xf32, #tpu.memory_space<vmem>>) attributes {dimension_semantics = [#tpu.dimension_semantics<parallel>, #tpu.dimension_semantics<parallel>], iteration_bounds = array<i64: 2, 4>, scalar_prefetch = 0 : i64, scratch_operands = 0 : i64, tpu.core_type = #tpu.core_type<tc>, window_params = [{transform_indices = @transform_0, window_bounds = array<i64: 1, 4, 384>}, {transform_indices = @transform_1, window_bounds = array<i64: 1, 4, 512>}, {transform_indices = @transform_2, window_bounds = array<i64: 1, 8, 384>}]} {
    %c0_i32 = arith.constant 0 : i32
    %0 = arith.cmpi eq, %arg1, %c0_i32 : i32
    %1 = arith.extui %0 : i1 to i32
    %c0_i32_0 = arith.constant 0 : i32
    %2 = arith.cmpi ne, %1, %c0_i32_0 : i32
    scf.if %2 {
      %c0 = arith.constant 0 : index
      %c0_4 = arith.constant 0 : index
      %c0_5 = arith.constant 0 : index
      %12 = vector.load %arg2[%c0, %c0_4, %c0_5] : memref<1x4x384xf32, #tpu.memory_space<vmem>>, vector<1x4x384xf32>
      %13 = vector.shape_cast %12 : vector<1x4x384xf32> to vector<4x384xf32>
      %c0_6 = arith.constant 0 : index
      %c0_7 = arith.constant 0 : index
      %c0_8 = arith.constant 0 : index
      %14 = vector.load %arg3[%c0_6, %c0_7, %c0_8] : memref<1x4x512xf32, #tpu.memory_space<vmem>>, vector<1x4x384xf32>
      %15 = vector.shape_cast %14 : vector<1x4x384xf32> to vector<4x384xf32>
      %16 = arith.mulf %13, %15 : vector<4x384xf32>
      %cst = arith.constant dense<0.000000e+00> : vector<384xf32>
      %17 = vector.multi_reduction <add>, %16, %cst [0] : vector<4x384xf32> to vector<384xf32>
      %18 = vector.shape_cast %17 : vector<384xf32> to vector<1x384xf32>
      %c0_9 = arith.constant 0 : index
      %c0_10 = arith.constant 0 : index
      %c0_11 = arith.constant 0 : index
      %19 = vector.load %arg4[%c0_9, %c0_10, %c0_11] : memref<1x8x384xf32, #tpu.memory_space<vmem>>, vector<1x1x384xf32>
      %20 = vector.shape_cast %19 : vector<1x1x384xf32> to vector<1x384xf32>
      %21 = vector.shape_cast %18 : vector<1x384xf32> to vector<1x1x384xf32>
      tpu.vector_store %arg4[%c0_9, %c0_10, %c0_11], %21 {strides = array<i32>} : memref<1x8x384xf32, #tpu.memory_space<vmem>>, vector<1x1x384xf32>,
      %c0_12 = arith.constant 0 : index
      %c0_13 = arith.constant 0 : index
      %c0_14 = arith.constant 0 : index
      %22 = vector.load %arg2[%c0_12, %c0_13, %c0_14] : memref<1x4x384xf32, #tpu.memory_space<vmem>>, vector<1x4x384xf32>
      %23 = vector.shape_cast %22 : vector<1x4x384xf32> to vector<4x384xf32>
      %c0_15 = arith.constant 0 : index
      %c0_16 = arith.constant 0 : index
      %c1 = arith.constant 1 : index
      %24 = vector.load %arg3[%c0_15, %c0_16, %c1] : memref<1x4x512xf32, #tpu.memory_space<vmem>>, vector<1x4x384xf32>
      %25 = vector.shape_cast %24 : vector<1x4x384xf32> to vector<4x384xf32>
      %26 = arith.mulf %23, %25 : vector<4x384xf32>
      %cst_17 = arith.constant dense<0.000000e+00> : vector<384xf32>
      %27 = vector.multi_reduction <add>, %26, %cst_17 [0] : vector<4x384xf32> to vector<384xf32>
      %28 = vector.shape_cast %27 : vector<384xf32> to vector<1x384xf32>
      %c0_18 = arith.constant 0 : index
      %c1_19 = arith.constant 1 : index
      %c0_20 = arith.constant 0 : index
      %29 = vector.load %arg4[%c0_18, %c1_19, %c0_20] : memref<1x8x384xf32, #tpu.memory_space<vmem>>, vector<1x1x384xf32>
      %30 = vector.shape_cast %29 : vector<1x1x384xf32> to vector<1x384xf32>
      %31 = vector.shape_cast %28 : vector<1x384xf32> to vector<1x1x384xf32>
      tpu.vector_store %arg4[%c0_18, %c1_19, %c0_20], %31 {strides = array<i32>} : memref<1x8x384xf32, #tpu.memory_space<vmem>>, vector<1x1x384xf32>,
      %c0_21 = arith.constant 0 : index
      %c0_22 = arith.constant 0 : index
      %c0_23 = arith.constant 0 : index
      %32 = vector.load %arg2[%c0_21, %c0_22, %c0_23] : memref<1x4x384xf32, #tpu.memory_space<vmem>>, vector<1x4x384xf32>
      %33 = vector.shape_cast %32 : vector<1x4x384xf32> to vector<4x384xf32>
      %c0_24 = arith.constant 0 : index
      %c0_25 = arith.constant 0 : index
      %c2 = arith.constant 2 : index
      %34 = vector.load %arg3[%c0_24, %c0_25, %c2] : memref<1x4x512xf32, #tpu.memory_space<vmem>>, vector<1x4x384xf32>
      %35 = vector.shape_cast %34 : vector<1x4x384xf32> to vector<4x384xf32>
      %36 = arith.mulf %33, %35 : vector<4x384xf32>
      %cst_26 = arith.constant dense<0.000000e+00> : vector<384xf32>
      %37 = vector.multi_reduction <add>, %36, %cst_26 [0] : vector<4x384xf32> to vector<384xf32>
      %38 = vector.shape_cast %37 : vector<384xf32> to vector<1x384xf32>
      %c0_27 = arith.constant 0 : index
      %c2_28 = arith.constant 2 : index
      %c0_29 = arith.constant 0 : index
      %39 = vector.load %arg4[%c0_27, %c2_28, %c0_29] : memref<1x8x384xf32, #tpu.memory_space<vmem>>, vector<1x1x384xf32>
      %40 = vector.shape_cast %39 : vector<1x1x384xf32> to vector<1x384xf32>
      %41 = vector.shape_cast %38 : vector<1x384xf32> to vector<1x1x384xf32>
      tpu.vector_store %arg4[%c0_27, %c2_28, %c0_29], %41 {strides = array<i32>} : memref<1x8x384xf32, #tpu.memory_space<vmem>>, vector<1x1x384xf32>,
      %c0_30 = arith.constant 0 : index
      %c0_31 = arith.constant 0 : index
      %c0_32 = arith.constant 0 : index
      %42 = vector.load %arg2[%c0_30, %c0_31, %c0_32] : memref<1x4x384xf32, #tpu.memory_space<vmem>>, vector<1x4x384xf32>
      %43 = vector.shape_cast %42 : vector<1x4x384xf32> to vector<4x384xf32>
      %c0_33 = arith.constant 0 : index
      %c0_34 = arith.constant 0 : index
      %c3 = arith.constant 3 : index
      %44 = vector.load %arg3[%c0_33, %c0_34, %c3] : memref<1x4x512xf32, #tpu.memory_space<vmem>>, vector<1x4x384xf32>
      %45 = vector.shape_cast %44 : vector<1x4x384xf32> to vector<4x384xf32>
      %46 = arith.mulf %43, %45 : vector<4x384xf32>
      %cst_35 = arith.constant dense<0.000000e+00> : vector<384xf32>
      %47 = vector.multi_reduction <add>, %46, %cst_35 [0] : vector<4x384xf32> to vector<384xf32>
      %48 = vector.shape_cast %47 : vector<384xf32> to vector<1x384xf32>
      %c0_36 = arith.constant 0 : index
      %c3_37 = arith.constant 3 : index
      %c0_38 = arith.constant 0 : index
      %49 = vector.load %arg4[%c0_36, %c3_37, %c0_38] : memref<1x8x384xf32, #tpu.memory_space<vmem>>, vector<1x1x384xf32>
      %50 = vector.shape_cast %49 : vector<1x1x384xf32> to vector<1x384xf32>
      %51 = vector.shape_cast %48 : vector<1x384xf32> to vector<1x1x384xf32>
      tpu.vector_store %arg4[%c0_36, %c3_37, %c0_38], %51 {strides = array<i32>} : memref<1x8x384xf32, #tpu.memory_space<vmem>>, vector<1x1x384xf32>,
      %c0_39 = arith.constant 0 : index
      %c0_40 = arith.constant 0 : index
      %c0_41 = arith.constant 0 : index
      %52 = vector.load %arg2[%c0_39, %c0_40, %c0_41] : memref<1x4x384xf32, #tpu.memory_space<vmem>>, vector<1x4x384xf32>
      %53 = vector.shape_cast %52 : vector<1x4x384xf32> to vector<4x384xf32>
      %c0_42 = arith.constant 0 : index
      %c0_43 = arith.constant 0 : index
      %c4 = arith.constant 4 : index
      %54 = vector.load %arg3[%c0_42, %c0_43, %c4] : memref<1x4x512xf32, #tpu.memory_space<vmem>>, vector<1x4x384xf32>
      %55 = vector.shape_cast %54 : vector<1x4x384xf32> to vector<4x384xf32>
      %56 = arith.mulf %53, %55 : vector<4x384xf32>
      %cst_44 = arith.constant dense<0.000000e+00> : vector<384xf32>
      %57 = vector.multi_reduction <add>, %56, %cst_44 [0] : vector<4x384xf32> to vector<384xf32>
      %58 = vector.shape_cast %57 : vector<384xf32> to vector<1x384xf32>
      %c0_45 = arith.constant 0 : index
      %c4_46 = arith.constant 4 : index
      %c0_47 = arith.constant 0 : index
      %59 = vector.load %arg4[%c0_45, %c4_46, %c0_47] : memref<1x8x384xf32, #tpu.memory_space<vmem>>, vector<1x1x384xf32>
      %60 = vector.shape_cast %59 : vector<1x1x384xf32> to vector<1x384xf32>
      %61 = vector.shape_cast %58 : vector<1x384xf32> to vector<1x1x384xf32>
      tpu.vector_store %arg4[%c0_45, %c4_46, %c0_47], %61 {strides = array<i32>} : memref<1x8x384xf32, #tpu.memory_space<vmem>>, vector<1x1x384xf32>,
      %c0_48 = arith.constant 0 : index
      %c0_49 = arith.constant 0 : index
      %c0_50 = arith.constant 0 : index
      %62 = vector.load %arg2[%c0_48, %c0_49, %c0_50] : memref<1x4x384xf32, #tpu.memory_space<vmem>>, vector<1x4x384xf32>
      %63 = vector.shape_cast %62 : vector<1x4x384xf32> to vector<4x384xf32>
      %c0_51 = arith.constant 0 : index
      %c0_52 = arith.constant 0 : index
      %c20 = arith.constant 20 : index
      %64 = vector.load %arg3[%c0_51, %c0_52, %c20] : memref<1x4x512xf32, #tpu.memory_space<vmem>>, vector<1x4x384xf32>
      %65 = vector.shape_cast %64 : vector<1x4x384xf32> to vector<4x384xf32>
      %66 = arith.mulf %63, %65 : vector<4x384xf32>
      %cst_53 = arith.constant dense<0.000000e+00> : vector<384xf32>
      %67 = vector.multi_reduction <add>, %66, %cst_53 [0] : vector<4x384xf32> to vector<384xf32>
      %68 = vector.shape_cast %67 : vector<384xf32> to vector<1x384xf32>
      %c0_54 = arith.constant 0 : index
      %c5 = arith.constant 5 : index
      %c0_55 = arith.constant 0 : index
      %69 = vector.load %arg4[%c0_54, %c5, %c0_55] : memref<1x8x384xf32, #tpu.memory_space<vmem>>, vector<1x1x384xf32>
      %70 = vector.shape_cast %69 : vector<1x1x384xf32> to vector<1x384xf32>
      %71 = vector.shape_cast %68 : vector<1x384xf32> to vector<1x1x384xf32>
      tpu.vector_store %arg4[%c0_54, %c5, %c0_55], %71 {strides = array<i32>} : memref<1x8x384xf32, #tpu.memory_space<vmem>>, vector<1x1x384xf32>,
      %c0_56 = arith.constant 0 : index
      %c0_57 = arith.constant 0 : index
      %c0_58 = arith.constant 0 : index
      %72 = vector.load %arg2[%c0_56, %c0_57, %c0_58] : memref<1x4x384xf32, #tpu.memory_space<vmem>>, vector<1x4x384xf32>
      %73 = vector.shape_cast %72 : vector<1x4x384xf32> to vector<4x384xf32>
      %c0_59 = arith.constant 0 : index
      %c0_60 = arith.constant 0 : index
      %c21 = arith.constant 21 : index
      %74 = vector.load %arg3[%c0_59, %c0_60, %c21] : memref<1x4x512xf32, #tpu.memory_space<vmem>>, vector<1x4x384xf32>
      %75 = vector.shape_cast %74 : vector<1x4x384xf32> to vector<4x384xf32>
      %76 = arith.mulf %73, %75 : vector<4x384xf32>
      %cst_61 = arith.constant dense<0.000000e+00> : vector<384xf32>
      %77 = vector.multi_reduction <add>, %76, %cst_61 [0] : vector<4x384xf32> to vector<384xf32>
      %78 = vector.shape_cast %77 : vector<384xf32> to vector<1x384xf32>
      %c0_62 = arith.constant 0 : index
      %c6 = arith.constant 6 : index
      %c0_63 = arith.constant 0 : index
      %79 = vector.load %arg4[%c0_62, %c6, %c0_63] : memref<1x8x384xf32, #tpu.memory_space<vmem>>, vector<1x1x384xf32>
      %80 = vector.shape_cast %79 : vector<1x1x384xf32> to vector<1x384xf32>
      %81 = vector.shape_cast %78 : vector<1x384xf32> to vector<1x1x384xf32>
      tpu.vector_store %arg4[%c0_62, %c6, %c0_63], %81 {strides = array<i32>} : memref<1x8x384xf32, #tpu.memory_space<vmem>>, vector<1x1x384xf32>,
      %c0_64 = arith.constant 0 : index
      %c0_65 = arith.constant 0 : index
      %c0_66 = arith.constant 0 : index
      %82 = vector.load %arg2[%c0_64, %c0_65, %c0_66] : memref<1x4x384xf32, #tpu.memory_space<vmem>>, vector<1x4x384xf32>
      %83 = vector.shape_cast %82 : vector<1x4x384xf32> to vector<4x384xf32>
      %c0_67 = arith.constant 0 : index
      %c0_68 = arith.constant 0 : index
      %c22 = arith.constant 22 : index
      %84 = vector.load %arg3[%c0_67, %c0_68, %c22] : memref<1x4x512xf32, #tpu.memory_space<vmem>>, vector<1x4x384xf32>
      %85 = vector.shape_cast %84 : vector<1x4x384xf32> to vector<4x384xf32>
      %86 = arith.mulf %83, %85 : vector<4x384xf32>
      %cst_69 = arith.constant dense<0.000000e+00> : vector<384xf32>
      %87 = vector.multi_reduction <add>, %86, %cst_69 [0] : vector<4x384xf32> to vector<384xf32>
      %88 = vector.shape_cast %87 : vector<384xf32> to vector<1x384xf32>
      %c0_70 = arith.constant 0 : index
      %c7 = arith.constant 7 : index
      %c0_71 = arith.constant 0 : index
      %89 = vector.load %arg4[%c0_70, %c7, %c0_71] : memref<1x8x384xf32, #tpu.memory_space<vmem>>, vector<1x1x384xf32>
      %90 = vector.shape_cast %89 : vector<1x1x384xf32> to vector<1x384xf32>
      %91 = vector.shape_cast %88 : vector<1x384xf32> to vector<1x1x384xf32>
      tpu.vector_store %arg4[%c0_70, %c7, %c0_71], %91 {strides = array<i32>} : memref<1x8x384xf32, #tpu.memory_space<vmem>>, vector<1x1x384xf32>,
    } else {
    }
    %c1_i32 = arith.constant 1 : i32
    %3 = arith.cmpi eq, %arg1, %c1_i32 : i32
    %4 = arith.extui %3 : i1 to i32
    %c0_i32_1 = arith.constant 0 : i32
    %5 = arith.cmpi ne, %4, %c0_i32_1 : i32
    scf.if %5 {
      %c0 = arith.constant 0 : index
      %c0_4 = arith.constant 0 : index
      %c0_5 = arith.constant 0 : index
      %12 = vector.load %arg2[%c0, %c0_4, %c0_5] : memref<1x4x384xf32, #tpu.memory_space<vmem>>, vector<1x4x384xf32>
      %13 = vector.shape_cast %12 : vector<1x4x384xf32> to vector<4x384xf32>
      %c0_6 = arith.constant 0 : index
      %c0_7 = arith.constant 0 : index
      %c23 = arith.constant 23 : index
      %14 = vector.load %arg3[%c0_6, %c0_7, %c23] : memref<1x4x512xf32, #tpu.memory_space<vmem>>, vector<1x4x384xf32>
      %15 = vector.shape_cast %14 : vector<1x4x384xf32> to vector<4x384xf32>
      %16 = arith.mulf %13, %15 : vector<4x384xf32>
      %cst = arith.constant dense<0.000000e+00> : vector<384xf32>
      %17 = vector.multi_reduction <add>, %16, %cst [0] : vector<4x384xf32> to vector<384xf32>
      %18 = vector.shape_cast %17 : vector<384xf32> to vector<1x384xf32>
      %c0_8 = arith.constant 0 : index
      %c0_9 = arith.constant 0 : index
      %c0_10 = arith.constant 0 : index
      %19 = vector.load %arg4[%c0_8, %c0_9, %c0_10] : memref<1x8x384xf32, #tpu.memory_space<vmem>>, vector<1x1x384xf32>
      %20 = vector.shape_cast %19 : vector<1x1x384xf32> to vector<1x384xf32>
      %21 = vector.shape_cast %18 : vector<1x384xf32> to vector<1x1x384xf32>
      tpu.vector_store %arg4[%c0_8, %c0_9, %c0_10], %21 {strides = array<i32>} : memref<1x8x384xf32, #tpu.memory_space<vmem>>, vector<1x1x384xf32>,
      %c0_11 = arith.constant 0 : index
      %c0_12 = arith.constant 0 : index
      %c0_13 = arith.constant 0 : index
      %22 = vector.load %arg2[%c0_11, %c0_12, %c0_13] : memref<1x4x384xf32, #tpu.memory_space<vmem>>, vector<1x4x384xf32>
      %23 = vector.shape_cast %22 : vector<1x4x384xf32> to vector<4x384xf32>
      %c0_14 = arith.constant 0 : index
      %c0_15 = arith.constant 0 : index
      %c24 = arith.constant 24 : index
      %24 = vector.load %arg3[%c0_14, %c0_15, %c24] : memref<1x4x512xf32, #tpu.memory_space<vmem>>, vector<1x4x384xf32>
      %25 = vector.shape_cast %24 : vector<1x4x384xf32> to vector<4x384xf32>
      %26 = arith.mulf %23, %25 : vector<4x384xf32>
      %cst_16 = arith.constant dense<0.000000e+00> : vector<384xf32>
      %27 = vector.multi_reduction <add>, %26, %cst_16 [0] : vector<4x384xf32> to vector<384xf32>
      %28 = vector.shape_cast %27 : vector<384xf32> to vector<1x384xf32>
      %c0_17 = arith.constant 0 : index
      %c1 = arith.constant 1 : index
      %c0_18 = arith.constant 0 : index
      %29 = vector.load %arg4[%c0_17, %c1, %c0_18] : memref<1x8x384xf32, #tpu.memory_space<vmem>>, vector<1x1x384xf32>
      %30 = vector.shape_cast %29 : vector<1x1x384xf32> to vector<1x384xf32>
      %31 = vector.shape_cast %28 : vector<1x384xf32> to vector<1x1x384xf32>
      tpu.vector_store %arg4[%c0_17, %c1, %c0_18], %31 {strides = array<i32>} : memref<1x8x384xf32, #tpu.memory_space<vmem>>, vector<1x1x384xf32>,
      %c0_19 = arith.constant 0 : index
      %c0_20 = arith.constant 0 : index
      %c0_21 = arith.constant 0 : index
      %32 = vector.load %arg2[%c0_19, %c0_20, %c0_21] : memref<1x4x384xf32, #tpu.memory_space<vmem>>, vector<1x4x384xf32>
      %33 = vector.shape_cast %32 : vector<1x4x384xf32> to vector<4x384xf32>
      %c0_22 = arith.constant 0 : index
      %c0_23 = arith.constant 0 : index
      %c40 = arith.constant 40 : index
      %34 = vector.load %arg3[%c0_22, %c0_23, %c40] : memref<1x4x512xf32, #tpu.memory_space<vmem>>, vector<1x4x384xf32>
      %35 = vector.shape_cast %34 : vector<1x4x384xf32> to vector<4x384xf32>
      %36 = arith.mulf %33, %35 : vector<4x384xf32>
      %cst_24 = arith.constant dense<0.000000e+00> : vector<384xf32>
      %37 = vector.multi_reduction <add>, %36, %cst_24 [0] : vector<4x384xf32> to vector<384xf32>
      %38 = vector.shape_cast %37 : vector<384xf32> to vector<1x384xf32>
      %c0_25 = arith.constant 0 : index
      %c2 = arith.constant 2 : index
      %c0_26 = arith.constant 0 : index
      %39 = vector.load %arg4[%c0_25, %c2, %c0_26] : memref<1x8x384xf32, #tpu.memory_space<vmem>>, vector<1x1x384xf32>
      %40 = vector.shape_cast %39 : vector<1x1x384xf32> to vector<1x384xf32>
      %41 = vector.shape_cast %38 : vector<1x384xf32> to vector<1x1x384xf32>
      tpu.vector_store %arg4[%c0_25, %c2, %c0_26], %41 {strides = array<i32>} : memref<1x8x384xf32, #tpu.memory_space<vmem>>, vector<1x1x384xf32>,
      %c0_27 = arith.constant 0 : index
      %c0_28 = arith.constant 0 : index
      %c0_29 = arith.constant 0 : index
      %42 = vector.load %arg2[%c0_27, %c0_28, %c0_29] : memref<1x4x384xf32, #tpu.memory_space<vmem>>, vector<1x4x384xf32>
      %43 = vector.shape_cast %42 : vector<1x4x384xf32> to vector<4x384xf32>
      %c0_30 = arith.constant 0 : index
      %c0_31 = arith.constant 0 : index
      %c41 = arith.constant 41 : index
      %44 = vector.load %arg3[%c0_30, %c0_31, %c41] : memref<1x4x512xf32, #tpu.memory_space<vmem>>, vector<1x4x384xf32>
      %45 = vector.shape_cast %44 : vector<1x4x384xf32> to vector<4x384xf32>
      %46 = arith.mulf %43, %45 : vector<4x384xf32>
      %cst_32 = arith.constant dense<0.000000e+00> : vector<384xf32>
      %47 = vector.multi_reduction <add>, %46, %cst_32 [0] : vector<4x384xf32> to vector<384xf32>
      %48 = vector.shape_cast %47 : vector<384xf32> to vector<1x384xf32>
      %c0_33 = arith.constant 0 : index
      %c3 = arith.constant 3 : index
      %c0_34 = arith.constant 0 : index
      %49 = vector.load %arg4[%c0_33, %c3, %c0_34] : memref<1x8x384xf32, #tpu.memory_space<vmem>>, vector<1x1x384xf32>
      %50 = vector.shape_cast %49 : vector<1x1x384xf32> to vector<1x384xf32>
      %51 = vector.shape_cast %48 : vector<1x384xf32> to vector<1x1x384xf32>
      tpu.vector_store %arg4[%c0_33, %c3, %c0_34], %51 {strides = array<i32>} : memref<1x8x384xf32, #tpu.memory_space<vmem>>, vector<1x1x384xf32>,
      %c0_35 = arith.constant 0 : index
      %c0_36 = arith.constant 0 : index
      %c0_37 = arith.constant 0 : index
      %52 = vector.load %arg2[%c0_35, %c0_36, %c0_37] : memref<1x4x384xf32, #tpu.memory_space<vmem>>, vector<1x4x384xf32>
      %53 = vector.shape_cast %52 : vector<1x4x384xf32> to vector<4x384xf32>
      %c0_38 = arith.constant 0 : index
      %c0_39 = arith.constant 0 : index
      %c42 = arith.constant 42 : index
      %54 = vector.load %arg3[%c0_38, %c0_39, %c42] : memref<1x4x512xf32, #tpu.memory_space<vmem>>, vector<1x4x384xf32>
      %55 = vector.shape_cast %54 : vector<1x4x384xf32> to vector<4x384xf32>
      %56 = arith.mulf %53, %55 : vector<4x384xf32>
      %cst_40 = arith.constant dense<0.000000e+00> : vector<384xf32>
      %57 = vector.multi_reduction <add>, %56, %cst_40 [0] : vector<4x384xf32> to vector<384xf32>
      %58 = vector.shape_cast %57 : vector<384xf32> to vector<1x384xf32>
      %c0_41 = arith.constant 0 : index
      %c4 = arith.constant 4 : index
      %c0_42 = arith.constant 0 : index
      %59 = vector.load %arg4[%c0_41, %c4, %c0_42] : memref<1x8x384xf32, #tpu.memory_space<vmem>>, vector<1x1x384xf32>
      %60 = vector.shape_cast %59 : vector<1x1x384xf32> to vector<1x384xf32>
      %61 = vector.shape_cast %58 : vector<1x384xf32> to vector<1x1x384xf32>
      tpu.vector_store %arg4[%c0_41, %c4, %c0_42], %61 {strides = array<i32>} : memref<1x8x384xf32, #tpu.memory_space<vmem>>, vector<1x1x384xf32>,
      %c0_43 = arith.constant 0 : index
      %c0_44 = arith.constant 0 : index
      %c0_45 = arith.constant 0 : index
      %62 = vector.load %arg2[%c0_43, %c0_44, %c0_45] : memref<1x4x384xf32, #tpu.memory_space<vmem>>, vector<1x4x384xf32>
      %63 = vector.shape_cast %62 : vector<1x4x384xf32> to vector<4x384xf32>
      %c0_46 = arith.constant 0 : index
      %c0_47 = arith.constant 0 : index
      %c43 = arith.constant 43 : index
      %64 = vector.load %arg3[%c0_46, %c0_47, %c43] : memref<1x4x512xf32, #tpu.memory_space<vmem>>, vector<1x4x384xf32>
      %65 = vector.shape_cast %64 : vector<1x4x384xf32> to vector<4x384xf32>
      %66 = arith.mulf %63, %65 : vector<4x384xf32>
      %cst_48 = arith.constant dense<0.000000e+00> : vector<384xf32>
      %67 = vector.multi_reduction <add>, %66, %cst_48 [0] : vector<4x384xf32> to vector<384xf32>
      %68 = vector.shape_cast %67 : vector<384xf32> to vector<1x384xf32>
      %c0_49 = arith.constant 0 : index
      %c5 = arith.constant 5 : index
      %c0_50 = arith.constant 0 : index
      %69 = vector.load %arg4[%c0_49, %c5, %c0_50] : memref<1x8x384xf32, #tpu.memory_space<vmem>>, vector<1x1x384xf32>
      %70 = vector.shape_cast %69 : vector<1x1x384xf32> to vector<1x384xf32>
      %71 = vector.shape_cast %68 : vector<1x384xf32> to vector<1x1x384xf32>
      tpu.vector_store %arg4[%c0_49, %c5, %c0_50], %71 {strides = array<i32>} : memref<1x8x384xf32, #tpu.memory_space<vmem>>, vector<1x1x384xf32>,
      %c0_51 = arith.constant 0 : index
      %c0_52 = arith.constant 0 : index
      %c0_53 = arith.constant 0 : index
      %72 = vector.load %arg2[%c0_51, %c0_52, %c0_53] : memref<1x4x384xf32, #tpu.memory_space<vmem>>, vector<1x4x384xf32>
      %73 = vector.shape_cast %72 : vector<1x4x384xf32> to vector<4x384xf32>
      %c0_54 = arith.constant 0 : index
      %c0_55 = arith.constant 0 : index
      %c44 = arith.constant 44 : index
      %74 = vector.load %arg3[%c0_54, %c0_55, %c44] : memref<1x4x512xf32, #tpu.memory_space<vmem>>, vector<1x4x384xf32>
      %75 = vector.shape_cast %74 : vector<1x4x384xf32> to vector<4x384xf32>
      %76 = arith.mulf %73, %75 : vector<4x384xf32>
      %cst_56 = arith.constant dense<0.000000e+00> : vector<384xf32>
      %77 = vector.multi_reduction <add>, %76, %cst_56 [0] : vector<4x384xf32> to vector<384xf32>
      %78 = vector.shape_cast %77 : vector<384xf32> to vector<1x384xf32>
      %c0_57 = arith.constant 0 : index
      %c6 = arith.constant 6 : index
      %c0_58 = arith.constant 0 : index
      %79 = vector.load %arg4[%c0_57, %c6, %c0_58] : memref<1x8x384xf32, #tpu.memory_space<vmem>>, vector<1x1x384xf32>
      %80 = vector.shape_cast %79 : vector<1x1x384xf32> to vector<1x384xf32>
      %81 = vector.shape_cast %78 : vector<1x384xf32> to vector<1x1x384xf32>
      tpu.vector_store %arg4[%c0_57, %c6, %c0_58], %81 {strides = array<i32>} : memref<1x8x384xf32, #tpu.memory_space<vmem>>, vector<1x1x384xf32>,
      %c0_59 = arith.constant 0 : index
      %c0_60 = arith.constant 0 : index
      %c0_61 = arith.constant 0 : index
      %82 = vector.load %arg2[%c0_59, %c0_60, %c0_61] : memref<1x4x384xf32, #tpu.memory_space<vmem>>, vector<1x4x384xf32>
      %83 = vector.shape_cast %82 : vector<1x4x384xf32> to vector<4x384xf32>
      %c0_62 = arith.constant 0 : index
      %c0_63 = arith.constant 0 : index
      %c60 = arith.constant 60 : index
      %84 = vector.load %arg3[%c0_62, %c0_63, %c60] : memref<1x4x512xf32, #tpu.memory_space<vmem>>, vector<1x4x384xf32>
      %85 = vector.shape_cast %84 : vector<1x4x384xf32> to vector<4x384xf32>
      %86 = arith.mulf %83, %85 : vector<4x384xf32>
      %cst_64 = arith.constant dense<0.000000e+00> : vector<384xf32>
      %87 = vector.multi_reduction <add>, %86, %cst_64 [0] : vector<4x384xf32> to vector<384xf32>
      %88 = vector.shape_cast %87 : vector<384xf32> to vector<1x384xf32>
      %c0_65 = arith.constant 0 : index
      %c7 = arith.constant 7 : index
      %c0_66 = arith.constant 0 : index
      %89 = vector.load %arg4[%c0_65, %c7, %c0_66] : memref<1x8x384xf32, #tpu.memory_space<vmem>>, vector<1x1x384xf32>
      %90 = vector.shape_cast %89 : vector<1x1x384xf32> to vector<1x384xf32>
      %91 = vector.shape_cast %88 : vector<1x384xf32> to vector<1x1x384xf32>
      tpu.vector_store %arg4[%c0_65, %c7, %c0_66], %91 {strides = array<i32>} : memref<1x8x384xf32, #tpu.memory_space<vmem>>, vector<1x1x384xf32>,
    } else {
    }
    %c2_i32 = arith.constant 2 : i32
    %6 = arith.cmpi eq, %arg1, %c2_i32 : i32
    %7 = arith.extui %6 : i1 to i32
    %c0_i32_2 = arith.constant 0 : i32
    %8 = arith.cmpi ne, %7, %c0_i32_2 : i32
    scf.if %8 {
      %c0 = arith.constant 0 : index
      %c0_4 = arith.constant 0 : index
      %c0_5 = arith.constant 0 : index
      %12 = vector.load %arg2[%c0, %c0_4, %c0_5] : memref<1x4x384xf32, #tpu.memory_space<vmem>>, vector<1x4x384xf32>
      %13 = vector.shape_cast %12 : vector<1x4x384xf32> to vector<4x384xf32>
      %c0_6 = arith.constant 0 : index
      %c0_7 = arith.constant 0 : index
      %c61 = arith.constant 61 : index
      %14 = vector.load %arg3[%c0_6, %c0_7, %c61] : memref<1x4x512xf32, #tpu.memory_space<vmem>>, vector<1x4x384xf32>
      %15 = vector.shape_cast %14 : vector<1x4x384xf32> to vector<4x384xf32>
      %16 = arith.mulf %13, %15 : vector<4x384xf32>
      %cst = arith.constant dense<0.000000e+00> : vector<384xf32>
      %17 = vector.multi_reduction <add>, %16, %cst [0] : vector<4x384xf32> to vector<384xf32>
      %18 = vector.shape_cast %17 : vector<384xf32> to vector<1x384xf32>
      %c0_8 = arith.constant 0 : index
      %c0_9 = arith.constant 0 : index
      %c0_10 = arith.constant 0 : index
      %19 = vector.load %arg4[%c0_8, %c0_9, %c0_10] : memref<1x8x384xf32, #tpu.memory_space<vmem>>, vector<1x1x384xf32>
      %20 = vector.shape_cast %19 : vector<1x1x384xf32> to vector<1x384xf32>
      %21 = vector.shape_cast %18 : vector<1x384xf32> to vector<1x1x384xf32>
      tpu.vector_store %arg4[%c0_8, %c0_9, %c0_10], %21 {strides = array<i32>} : memref<1x8x384xf32, #tpu.memory_space<vmem>>, vector<1x1x384xf32>,
      %c0_11 = arith.constant 0 : index
      %c0_12 = arith.constant 0 : index
      %c0_13 = arith.constant 0 : index
      %22 = vector.load %arg2[%c0_11, %c0_12, %c0_13] : memref<1x4x384xf32, #tpu.memory_space<vmem>>, vector<1x4x384xf32>
      %23 = vector.shape_cast %22 : vector<1x4x384xf32> to vector<4x384xf32>
      %c0_14 = arith.constant 0 : index
      %c0_15 = arith.constant 0 : index
      %c62 = arith.constant 62 : index
      %24 = vector.load %arg3[%c0_14, %c0_15, %c62] : memref<1x4x512xf32, #tpu.memory_space<vmem>>, vector<1x4x384xf32>
      %25 = vector.shape_cast %24 : vector<1x4x384xf32> to vector<4x384xf32>
      %26 = arith.mulf %23, %25 : vector<4x384xf32>
      %cst_16 = arith.constant dense<0.000000e+00> : vector<384xf32>
      %27 = vector.multi_reduction <add>, %26, %cst_16 [0] : vector<4x384xf32> to vector<384xf32>
      %28 = vector.shape_cast %27 : vector<384xf32> to vector<1x384xf32>
      %c0_17 = arith.constant 0 : index
      %c1 = arith.constant 1 : index
      %c0_18 = arith.constant 0 : index
      %29 = vector.load %arg4[%c0_17, %c1, %c0_18] : memref<1x8x384xf32, #tpu.memory_space<vmem>>, vector<1x1x384xf32>
      %30 = vector.shape_cast %29 : vector<1x1x384xf32> to vector<1x384xf32>
      %31 = vector.shape_cast %28 : vector<1x384xf32> to vector<1x1x384xf32>
      tpu.vector_store %arg4[%c0_17, %c1, %c0_18], %31 {strides = array<i32>} : memref<1x8x384xf32, #tpu.memory_space<vmem>>, vector<1x1x384xf32>,
      %c0_19 = arith.constant 0 : index
      %c0_20 = arith.constant 0 : index
      %c0_21 = arith.constant 0 : index
      %32 = vector.load %arg2[%c0_19, %c0_20, %c0_21] : memref<1x4x384xf32, #tpu.memory_space<vmem>>, vector<1x4x384xf32>
      %33 = vector.shape_cast %32 : vector<1x4x384xf32> to vector<4x384xf32>
      %c0_22 = arith.constant 0 : index
      %c0_23 = arith.constant 0 : index
      %c63 = arith.constant 63 : index
      %34 = vector.load %arg3[%c0_22, %c0_23, %c63] : memref<1x4x512xf32, #tpu.memory_space<vmem>>, vector<1x4x384xf32>
      %35 = vector.shape_cast %34 : vector<1x4x384xf32> to vector<4x384xf32>
      %36 = arith.mulf %33, %35 : vector<4x384xf32>
      %cst_24 = arith.constant dense<0.000000e+00> : vector<384xf32>
      %37 = vector.multi_reduction <add>, %36, %cst_24 [0] : vector<4x384xf32> to vector<384xf32>
      %38 = vector.shape_cast %37 : vector<384xf32> to vector<1x384xf32>
      %c0_25 = arith.constant 0 : index
      %c2 = arith.constant 2 : index
      %c0_26 = arith.constant 0 : index
      %39 = vector.load %arg4[%c0_25, %c2, %c0_26] : memref<1x8x384xf32, #tpu.memory_space<vmem>>, vector<1x1x384xf32>
      %40 = vector.shape_cast %39 : vector<1x1x384xf32> to vector<1x384xf32>
      %41 = vector.shape_cast %38 : vector<1x384xf32> to vector<1x1x384xf32>
      tpu.vector_store %arg4[%c0_25, %c2, %c0_26], %41 {strides = array<i32>} : memref<1x8x384xf32, #tpu.memory_space<vmem>>, vector<1x1x384xf32>,
      %c0_27 = arith.constant 0 : index
      %c0_28 = arith.constant 0 : index
      %c0_29 = arith.constant 0 : index
      %42 = vector.load %arg2[%c0_27, %c0_28, %c0_29] : memref<1x4x384xf32, #tpu.memory_space<vmem>>, vector<1x4x384xf32>
      %43 = vector.shape_cast %42 : vector<1x4x384xf32> to vector<4x384xf32>
      %c0_30 = arith.constant 0 : index
      %c0_31 = arith.constant 0 : index
      %c64 = arith.constant 64 : index
      %44 = vector.load %arg3[%c0_30, %c0_31, %c64] : memref<1x4x512xf32, #tpu.memory_space<vmem>>, vector<1x4x384xf32>
      %45 = vector.shape_cast %44 : vector<1x4x384xf32> to vector<4x384xf32>
      %46 = arith.mulf %43, %45 : vector<4x384xf32>
      %cst_32 = arith.constant dense<0.000000e+00> : vector<384xf32>
      %47 = vector.multi_reduction <add>, %46, %cst_32 [0] : vector<4x384xf32> to vector<384xf32>
      %48 = vector.shape_cast %47 : vector<384xf32> to vector<1x384xf32>
      %c0_33 = arith.constant 0 : index
      %c3 = arith.constant 3 : index
      %c0_34 = arith.constant 0 : index
      %49 = vector.load %arg4[%c0_33, %c3, %c0_34] : memref<1x8x384xf32, #tpu.memory_space<vmem>>, vector<1x1x384xf32>
      %50 = vector.shape_cast %49 : vector<1x1x384xf32> to vector<1x384xf32>
      %51 = vector.shape_cast %48 : vector<1x384xf32> to vector<1x1x384xf32>
      tpu.vector_store %arg4[%c0_33, %c3, %c0_34], %51 {strides = array<i32>} : memref<1x8x384xf32, #tpu.memory_space<vmem>>, vector<1x1x384xf32>,
      %c0_35 = arith.constant 0 : index
      %c0_36 = arith.constant 0 : index
      %c0_37 = arith.constant 0 : index
      %52 = vector.load %arg2[%c0_35, %c0_36, %c0_37] : memref<1x4x384xf32, #tpu.memory_space<vmem>>, vector<1x4x384xf32>
      %53 = vector.shape_cast %52 : vector<1x4x384xf32> to vector<4x384xf32>
      %c0_38 = arith.constant 0 : index
      %c0_39 = arith.constant 0 : index
      %c80 = arith.constant 80 : index
      %54 = vector.load %arg3[%c0_38, %c0_39, %c80] : memref<1x4x512xf32, #tpu.memory_space<vmem>>, vector<1x4x384xf32>
      %55 = vector.shape_cast %54 : vector<1x4x384xf32> to vector<4x384xf32>
      %56 = arith.mulf %53, %55 : vector<4x384xf32>
      %cst_40 = arith.constant dense<0.000000e+00> : vector<384xf32>
      %57 = vector.multi_reduction <add>, %56, %cst_40 [0] : vector<4x384xf32> to vector<384xf32>
      %58 = vector.shape_cast %57 : vector<384xf32> to vector<1x384xf32>
      %c0_41 = arith.constant 0 : index
      %c4 = arith.constant 4 : index
      %c0_42 = arith.constant 0 : index
      %59 = vector.load %arg4[%c0_41, %c4, %c0_42] : memref<1x8x384xf32, #tpu.memory_space<vmem>>, vector<1x1x384xf32>
      %60 = vector.shape_cast %59 : vector<1x1x384xf32> to vector<1x384xf32>
      %61 = vector.shape_cast %58 : vector<1x384xf32> to vector<1x1x384xf32>
      tpu.vector_store %arg4[%c0_41, %c4, %c0_42], %61 {strides = array<i32>} : memref<1x8x384xf32, #tpu.memory_space<vmem>>, vector<1x1x384xf32>,
      %c0_43 = arith.constant 0 : index
      %c0_44 = arith.constant 0 : index
      %c0_45 = arith.constant 0 : index
      %62 = vector.load %arg2[%c0_43, %c0_44, %c0_45] : memref<1x4x384xf32, #tpu.memory_space<vmem>>, vector<1x4x384xf32>
      %63 = vector.shape_cast %62 : vector<1x4x384xf32> to vector<4x384xf32>
      %c0_46 = arith.constant 0 : index
      %c0_47 = arith.constant 0 : index
      %c81 = arith.constant 81 : index
      %64 = vector.load %arg3[%c0_46, %c0_47, %c81] : memref<1x4x512xf32, #tpu.memory_space<vmem>>, vector<1x4x384xf32>
      %65 = vector.shape_cast %64 : vector<1x4x384xf32> to vector<4x384xf32>
      %66 = arith.mulf %63, %65 : vector<4x384xf32>
      %cst_48 = arith.constant dense<0.000000e+00> : vector<384xf32>
      %67 = vector.multi_reduction <add>, %66, %cst_48 [0] : vector<4x384xf32> to vector<384xf32>
      %68 = vector.shape_cast %67 : vector<384xf32> to vector<1x384xf32>
      %c0_49 = arith.constant 0 : index
      %c5 = arith.constant 5 : index
      %c0_50 = arith.constant 0 : index
      %69 = vector.load %arg4[%c0_49, %c5, %c0_50] : memref<1x8x384xf32, #tpu.memory_space<vmem>>, vector<1x1x384xf32>
      %70 = vector.shape_cast %69 : vector<1x1x384xf32> to vector<1x384xf32>
      %71 = vector.shape_cast %68 : vector<1x384xf32> to vector<1x1x384xf32>
      tpu.vector_store %arg4[%c0_49, %c5, %c0_50], %71 {strides = array<i32>} : memref<1x8x384xf32, #tpu.memory_space<vmem>>, vector<1x1x384xf32>,
      %c0_51 = arith.constant 0 : index
      %c0_52 = arith.constant 0 : index
      %c0_53 = arith.constant 0 : index
      %72 = vector.load %arg2[%c0_51, %c0_52, %c0_53] : memref<1x4x384xf32, #tpu.memory_space<vmem>>, vector<1x4x384xf32>
      %73 = vector.shape_cast %72 : vector<1x4x384xf32> to vector<4x384xf32>
      %c0_54 = arith.constant 0 : index
      %c0_55 = arith.constant 0 : index
      %c82 = arith.constant 82 : index
      %74 = vector.load %arg3[%c0_54, %c0_55, %c82] : memref<1x4x512xf32, #tpu.memory_space<vmem>>, vector<1x4x384xf32>
      %75 = vector.shape_cast %74 : vector<1x4x384xf32> to vector<4x384xf32>
      %76 = arith.mulf %73, %75 : vector<4x384xf32>
      %cst_56 = arith.constant dense<0.000000e+00> : vector<384xf32>
      %77 = vector.multi_reduction <add>, %76, %cst_56 [0] : vector<4x384xf32> to vector<384xf32>
      %78 = vector.shape_cast %77 : vector<384xf32> to vector<1x384xf32>
      %c0_57 = arith.constant 0 : index
      %c6 = arith.constant 6 : index
      %c0_58 = arith.constant 0 : index
      %79 = vector.load %arg4[%c0_57, %c6, %c0_58] : memref<1x8x384xf32, #tpu.memory_space<vmem>>, vector<1x1x384xf32>
      %80 = vector.shape_cast %79 : vector<1x1x384xf32> to vector<1x384xf32>
      %81 = vector.shape_cast %78 : vector<1x384xf32> to vector<1x1x384xf32>
      tpu.vector_store %arg4[%c0_57, %c6, %c0_58], %81 {strides = array<i32>} : memref<1x8x384xf32, #tpu.memory_space<vmem>>, vector<1x1x384xf32>,
      %c0_59 = arith.constant 0 : index
      %c0_60 = arith.constant 0 : index
      %c0_61 = arith.constant 0 : index
      %82 = vector.load %arg2[%c0_59, %c0_60, %c0_61] : memref<1x4x384xf32, #tpu.memory_space<vmem>>, vector<1x4x384xf32>
      %83 = vector.shape_cast %82 : vector<1x4x384xf32> to vector<4x384xf32>
      %c0_62 = arith.constant 0 : index
      %c0_63 = arith.constant 0 : index
      %c83 = arith.constant 83 : index
      %84 = vector.load %arg3[%c0_62, %c0_63, %c83] : memref<1x4x512xf32, #tpu.memory_space<vmem>>, vector<1x4x384xf32>
      %85 = vector.shape_cast %84 : vector<1x4x384xf32> to vector<4x384xf32>
      %86 = arith.mulf %83, %85 : vector<4x384xf32>
      %cst_64 = arith.constant dense<0.000000e+00> : vector<384xf32>
      %87 = vector.multi_reduction <add>, %86, %cst_64 [0] : vector<4x384xf32> to vector<384xf32>
      %88 = vector.shape_cast %87 : vector<384xf32> to vector<1x384xf32>
      %c0_65 = arith.constant 0 : index
      %c7 = arith.constant 7 : index
      %c0_66 = arith.constant 0 : index
      %89 = vector.load %arg4[%c0_65, %c7, %c0_66] : memref<1x8x384xf32, #tpu.memory_space<vmem>>, vector<1x1x384xf32>
      %90 = vector.shape_cast %89 : vector<1x1x384xf32> to vector<1x384xf32>
      %91 = vector.shape_cast %88 : vector<1x384xf32> to vector<1x1x384xf32>
      tpu.vector_store %arg4[%c0_65, %c7, %c0_66], %91 {strides = array<i32>} : memref<1x8x384xf32, #tpu.memory_space<vmem>>, vector<1x1x384xf32>,
    } else {
    }
    %c3_i32 = arith.constant 3 : i32
    %9 = arith.cmpi eq, %arg1, %c3_i32 : i32
    %10 = arith.extui %9 : i1 to i32
    %c0_i32_3 = arith.constant 0 : i32
    %11 = arith.cmpi ne, %10, %c0_i32_3 : i32
    scf.if %11 {
      %c0 = arith.constant 0 : index
      %c0_4 = arith.constant 0 : index
      %c0_5 = arith.constant 0 : index
      %12 = vector.load %arg2[%c0, %c0_4, %c0_5] : memref<1x4x384xf32, #tpu.memory_space<vmem>>, vector<1x4x384xf32>
      %13 = vector.shape_cast %12 : vector<1x4x384xf32> to vector<4x384xf32>
      %c0_6 = arith.constant 0 : index
      %c0_7 = arith.constant 0 : index
      %c84 = arith.constant 84 : index
      %14 = vector.load %arg3[%c0_6, %c0_7, %c84] : memref<1x4x512xf32, #tpu.memory_space<vmem>>, vector<1x4x384xf32>
      %15 = vector.shape_cast %14 : vector<1x4x384xf32> to vector<4x384xf32>
      %16 = arith.mulf %13, %15 : vector<4x384xf32>
      %cst = arith.constant dense<0.000000e+00> : vector<384xf32>
      %17 = vector.multi_reduction <add>, %16, %cst [0] : vector<4x384xf32> to vector<384xf32>
      %18 = vector.shape_cast %17 : vector<384xf32> to vector<1x384xf32>
      %c0_8 = arith.constant 0 : index
      %c0_9 = arith.constant 0 : index
      %c0_10 = arith.constant 0 : index
      %19 = vector.load %arg4[%c0_8, %c0_9, %c0_10] : memref<1x8x384xf32, #tpu.memory_space<vmem>>, vector<1x1x384xf32>
      %20 = vector.shape_cast %19 : vector<1x1x384xf32> to vector<1x384xf32>
      %21 = vector.shape_cast %18 : vector<1x384xf32> to vector<1x1x384xf32>
      tpu.vector_store %arg4[%c0_8, %c0_9, %c0_10], %21 {strides = array<i32>} : memref<1x8x384xf32, #tpu.memory_space<vmem>>, vector<1x1x384xf32>,
      %cst_11 = arith.constant 0.000000e+00 : f32
      %22 = vector.broadcast %cst_11 : f32 to vector<1x384xf32>
      %c0_12 = arith.constant 0 : index
      %c1 = arith.constant 1 : index
      %c0_13 = arith.constant 0 : index
      %23 = vector.load %arg4[%c0_12, %c1, %c0_13] : memref<1x8x384xf32, #tpu.memory_space<vmem>>, vector<1x1x384xf32>
      %24 = vector.shape_cast %23 : vector<1x1x384xf32> to vector<1x384xf32>
      %25 = vector.shape_cast %22 : vector<1x384xf32> to vector<1x1x384xf32>
      tpu.vector_store %arg4[%c0_12, %c1, %c0_13], %25 {strides = array<i32>} : memref<1x8x384xf32, #tpu.memory_space<vmem>>, vector<1x1x384xf32>,
      %cst_14 = arith.constant 0.000000e+00 : f32
      %26 = vector.broadcast %cst_14 : f32 to vector<1x384xf32>
      %c0_15 = arith.constant 0 : index
      %c2 = arith.constant 2 : index
      %c0_16 = arith.constant 0 : index
      %27 = vector.load %arg4[%c0_15, %c2, %c0_16] : memref<1x8x384xf32, #tpu.memory_space<vmem>>, vector<1x1x384xf32>
      %28 = vector.shape_cast %27 : vector<1x1x384xf32> to vector<1x384xf32>
      %29 = vector.shape_cast %26 : vector<1x384xf32> to vector<1x1x384xf32>
      tpu.vector_store %arg4[%c0_15, %c2, %c0_16], %29 {strides = array<i32>} : memref<1x8x384xf32, #tpu.memory_space<vmem>>, vector<1x1x384xf32>,
      %cst_17 = arith.constant 0.000000e+00 : f32
      %30 = vector.broadcast %cst_17 : f32 to vector<1x384xf32>
      %c0_18 = arith.constant 0 : index
      %c3 = arith.constant 3 : index
      %c0_19 = arith.constant 0 : index
      %31 = vector.load %arg4[%c0_18, %c3, %c0_19] : memref<1x8x384xf32, #tpu.memory_space<vmem>>, vector<1x1x384xf32>
      %32 = vector.shape_cast %31 : vector<1x1x384xf32> to vector<1x384xf32>
      %33 = vector.shape_cast %30 : vector<1x384xf32> to vector<1x1x384xf32>
      tpu.vector_store %arg4[%c0_18, %c3, %c0_19], %33 {strides = array<i32>} : memref<1x8x384xf32, #tpu.memory_space<vmem>>, vector<1x1x384xf32>,
      %cst_20 = arith.constant 0.000000e+00 : f32
      %34 = vector.broadcast %cst_20 : f32 to vector<1x384xf32>
      %c0_21 = arith.constant 0 : index
      %c4 = arith.constant 4 : index
      %c0_22 = arith.constant 0 : index
      %35 = vector.load %arg4[%c0_21, %c4, %c0_22] : memref<1x8x384xf32, #tpu.memory_space<vmem>>, vector<1x1x384xf32>
      %36 = vector.shape_cast %35 : vector<1x1x384xf32> to vector<1x384xf32>
      %37 = vector.shape_cast %34 : vector<1x384xf32> to vector<1x1x384xf32>
      tpu.vector_store %arg4[%c0_21, %c4, %c0_22], %37 {strides = array<i32>} : memref<1x8x384xf32, #tpu.memory_space<vmem>>, vector<1x1x384xf32>,
      %cst_23 = arith.constant 0.000000e+00 : f32
      %38 = vector.broadcast %cst_23 : f32 to vector<1x384xf32>
      %c0_24 = arith.constant 0 : index
      %c5 = arith.constant 5 : index
      %c0_25 = arith.constant 0 : index
      %39 = vector.load %arg4[%c0_24, %c5, %c0_25] : memref<1x8x384xf32, #tpu.memory_space<vmem>>, vector<1x1x384xf32>
      %40 = vector.shape_cast %39 : vector<1x1x384xf32> to vector<1x384xf32>
      %41 = vector.shape_cast %38 : vector<1x384xf32> to vector<1x1x384xf32>
      tpu.vector_store %arg4[%c0_24, %c5, %c0_25], %41 {strides = array<i32>} : memref<1x8x384xf32, #tpu.memory_space<vmem>>, vector<1x1x384xf32>,
      %cst_26 = arith.constant 0.000000e+00 : f32
      %42 = vector.broadcast %cst_26 : f32 to vector<1x384xf32>
      %c0_27 = arith.constant 0 : index
      %c6 = arith.constant 6 : index
      %c0_28 = arith.constant 0 : index
      %43 = vector.load %arg4[%c0_27, %c6, %c0_28] : memref<1x8x384xf32, #tpu.memory_space<vmem>>, vector<1x1x384xf32>
      %44 = vector.shape_cast %43 : vector<1x1x384xf32> to vector<1x384xf32>
      %45 = vector.shape_cast %42 : vector<1x384xf32> to vector<1x1x384xf32>
      tpu.vector_store %arg4[%c0_27, %c6, %c0_28], %45 {strides = array<i32>} : memref<1x8x384xf32, #tpu.memory_space<vmem>>, vector<1x1x384xf32>,
      %cst_29 = arith.constant 0.000000e+00 : f32
      %46 = vector.broadcast %cst_29 : f32 to vector<1x384xf32>
      %c0_30 = arith.constant 0 : index
      %c7 = arith.constant 7 : index
      %c0_31 = arith.constant 0 : index
      %47 = vector.load %arg4[%c0_30, %c7, %c0_31] : memref<1x8x384xf32, #tpu.memory_space<vmem>>, vector<1x1x384xf32>
      %48 = vector.shape_cast %47 : vector<1x1x384xf32> to vector<1x384xf32>
      %49 = vector.shape_cast %46 : vector<1x384xf32> to vector<1x1x384xf32>
      tpu.vector_store %arg4[%c0_30, %c7, %c0_31], %49 {strides = array<i32>} : memref<1x8x384xf32, #tpu.memory_space<vmem>>, vector<1x1x384xf32>,
    } else {
    }
    return
  }
  func.func @transform_0(%arg0: i32, %arg1: i32) -> (i32, i32, i32) {
    %c0_i32 = arith.constant 0 : i32
    %c0_i32_0 = arith.constant 0 : i32
    %c0_i32_1 = arith.constant 0 : i32
    return %arg0, %c0_i32, %c0_i32_0 : i32, i32, i32
  }
  func.func @transform_1(%arg0: i32, %arg1: i32) -> (i32, i32, i32) {
    %c0_i32 = arith.constant 0 : i32
    %c0_i32_0 = arith.constant 0 : i32
    %c0_i32_1 = arith.constant 0 : i32
    return %arg0, %c0_i32, %c0_i32_0 : i32, i32, i32
  }
  func.func @transform_2(%arg0: i32, %arg1: i32) -> (i32, i32, i32) {
    %c0_i32 = arith.constant 0 : i32
    %c0_i32_0 = arith.constant 0 : i32
    return %arg0, %arg1, %c0_i32 : i32, i32, i32
  }
}

</mosaic_0001>

<bundles_post_ra>
// kernel: tpu_custom_call.1
= control target key start
LH: loop header
LB: loop body
LE: loop exit
PB: predicated region body
PF: predicated region fallthrough
CT: control target
= control target key end

     0   :  { %s3266_s0 = inlined_call_operand.hbm [shape: f32[2,4,384], index: 0, kind: input, shape index: {}]   ;;  %s3267_s1 = inlined_call_operand.hbm [shape: f32[2,4,512], index: 1, kind: input, shape index: {}]   ;;  %s3268_s2 = inlined_call_operand.hbm [shape: f32[2,32,384], index: 2, kind: output, shape index: {}]  }
   0x1   :  { %3272 = sst [smem:[#allocation14_spill]] %s3266_s0 }
   0x2   :  { %7 = vsyncpa [#allocation3], 0 }
   0x3   :  { %9 = vsyncpa [#allocation3 + $0x1], 0 }
   0x4   :  { %10 = vsyncpa [#allocation6], 0 }
   0x5   :  { %12 = vsyncpa [#allocation6 + $0x1], 0 }
   0x6   :  { %13 = vsyncpa [#allocation4], 0 }
   0x7   :  { %15 = vsyncpa [#allocation4 + $0x1], 0  ;;  %s2642_s9 = smov 0   ;;  %s2644_s10 = smov 0  }
   0x8   :  { %s2646_s11 = smov 0   ;;  %s2648_s12 = smov 0  }
   0x9   :  { %s2650_s13 = smov 0   ;;  %s2652_s14 = smov 0  }
   0xa   :  { %s2654_s15 = smov 0   ;;  %s2656_s16 = smov 0  }
   0xb   :  { %s2658_s17 = smov 0   ;;  %s2660_s18 = smov 0  }
   0xc   :  { %s2662_s19 = smov 0  }
   0xd LB: > { %3273 = sst [smem:[#allocation11_spill]] %s2585_s17  ;;  %s2225_s20 = sadd.s32 4294967295, %s2593_s19   ;;  %s2593_s19 = sphi %s2662_s19, %s21_s19   ;;  %s2589_s18 = sphi %s2660_s18, %s3301_s18   ;;  %s2585_s17 = sphi %s2658_s17, %s3292_s17   ;;  %s2581_s16 = sphi %s2656_s16, %s3300_s16   ;;  %s2577_s15 = sphi %s2654_s15, %s3291_s15   ;;  %s2573_s14 = sphi %s2652_s14, %s3299_s14   ;;  %s2569_s13 = sphi %s2650_s13, %s3298_s13   ;;  %s2565_s12 = sphi %s2648_s12, %s3297_s12   ;;  %s2561_s11 = sphi %s2646_s11, %s3296_s11   ;;  %s2557_s10 = sphi %s2644_s10, %s3295_s10   ;;  %s2553_s9 = sphi %s2642_s9, %s3294_s9  }
   0xe   : > { %s2226_s21 = sadd.s32 4294967294, %s2593_s19   ;;  %s30_s22 = sadd.s32 1, %s2585_s17 }
   0xf   : > { %s33_s23 = sadd.s32 1, %s2589_s18  ;;  %p31_p0 = scmp.ge.s32.totalorder %s30_s22, 4 }
  0x10   : > { %s40_s24 = sadd.s32 1, %s2573_s14  ;;  %p47_p1 = scmp.ne.s32.totalorder %s2573_s14, %s2569_s13 }
  0x11   : > { %p48_p2 = scmp.eq.s32.totalorder %s2593_s19, 0  ;;  %s3303_s22 = smov (%p31_p0, %s30_s22), 0 }
  0x12   : > { %3274 = sst [smem:[#allocation12_spill]] %s3303_s22  ;;  %s3305_s23 = smov (!%p31_p0, %s33_s23), %s2589_s18 }
  0x13   : > { %p2706_p3 = por %p48_p2, %p47_p1  ;;  %p53_p4 = scmp.ne.s32.totalorder %s2569_s13, %s2565_s12 }
  0x14   : > { %p35_p5 = scmp.ge.s32.totalorder %s3305_s23, 2  ;;  %p54_p6 = scmp.eq.s32.totalorder %s2225_s20, 0 }
  0x15   : > { %s90_s26 = ssub.s32 %s2585_s17, %s3303_s22  ;;  %s94_s27 = sadd.s32 1, %s2561_s11 }
  0x16   : > { %s3307_s23 = smov (%p35_p5, %s3305_s23), 0  ;;  %p2716_p7 = por %p54_p6, %p53_p4 }
  0x17   : > { %3276 = sst [smem:[#allocation13_spill]] %s3307_s23  ;;  %p104_p8 = scmp.ne.s32.totalorder %s2561_s11, %s2557_s10 }
  0x18   : > { %s37_s29 = ssub.s32 %s2589_s18, %s3307_s23  ;;  %p105_p9 = scmp.eq.s32.totalorder %s2225_s20, 7 }
  0x19   : > { %p38_p10 = scmp.eq.s32.totalorder %s37_s29, 0  ;;  %s91_s30 = sor.u32 %s90_s26, %s37_s29 }
  0x1a   : > { %p92_p11 = scmp.eq.s32.totalorder %s91_s30, 0  ;;  %p2724_p12 = por %p105_p9, %p104_p8 }
  0x1b   : > { %s2729_s4 = scalar_select %p38_p10, %s2573_s14, %s40_s24  }
  0x1c   : > { %s2732_s5 = scalar_select %p92_p11, %s2561_s11, %s94_s27  }
  0x1d   : > { %p110_p13 = scmp.ne.s32.totalorder %s2557_s10, %s2553_s9  ;;  %p111_p0 = scmp.eq.s32.totalorder %s2226_s21, 7 }
  0x1e   : > { %p2294_p1 = scmp.lt.s32.totalorder %s2593_s19, 8  ;;  %s2742_s7 = sand.u32 1, %s2573_s14  }
  0x1f   : > { %p2737_p2 = por %p111_p0, %p110_p13  ;;  %s2271_s8 = smul.u32 12, %s2742_s7 }
  0x20   : > { %s2272_s12 = smul.u32 192, %s2589_s18  ;;  %p2748_p4 = pnand %p2294_p1, %p2706_p3 }
  0x21   : > { %p2233_p5 = scmp.ge.s32.totalorder %s2593_s19, 1  ;;  %s3281_s0 = sld [smem:[#allocation14_spill]] }
  0x22   : > { %s135_s27 = scalar_lea.vmem [#allocation2], %s2271_s8  ;;  %s132_s30 = scalar_lea.sflag [#allocation3], %s2742_s7 }
  0x23   : > { %s143_s29 = sshll.u32 %s135_s27, 4  ;;  %p2415_p6 = pneg %p2748_p4  ;;  %s144_s29 = int_to_ptr.vmem [resolvable:$true] %s143_s29 }
  0x24   : > { %s2426_s23 = scalar_lea.vmem %s144_s29, 192  ;;  %s2595_s25 = smov [#allocation2]  }
  0x25   : > { %p2427_p8 = scmp.ne.s32.totalorder %s144_s29, %s2426_s23  ;;  %s2431_s22 = sshll.u32 %s2595_s25, 4  ;;  %s2432_s22 = int_to_ptr.vmem [resolvable:$false] %s2431_s22 }
  0x26   : > { %s2433_s17 = scalar_lea.vmem %s2432_s22, 384  ;;  %p2434_p10 = scmp.lt.s32.totalorder %s144_s29, %s2432_s22 }
  0x27   : > { %s141_s26 = scalar_lea.hbm %s3281_s0, %s2272_s12  ;;  %p2429_p3 = pnand %p2427_p8, %p2415_p6 }
  0x28   : > { %p2435_p11 = scmp.lt.s32.totalorder %s2433_s17, %s2426_s23 }
  0x29   : > { %p2430_p9 = pneg %p2429_p3 }
  0x2a   : > { %p2436_p13 = por %p2435_p11, %p2434_p10 }
  0x2c   : > { %p2437_p0 = pnand %p2436_p13, %p2430_p9 }
  0x2e   : > { %2440 = shalt.err (!%p2437_p0)
}
  0x2f   : > { %2286 = dma.hbm_to_vmem [thread:$0]  (!%p2748_p4), %s141_s26, 192, %s144_s29, %s132_s30  }
  0x30   : > { %p167_p1 = scmp.lt.s32.totalorder %s2593_s19, 9  ;;  %s2230_s8 = sshll.u32 %s2742_s7, 4 }
  0x31   : > { %s2270_s12 = sshll.u32 %s2589_s18, 8  ;;  %s154_s24 = scalar_lea.vmem [#allocation5], %s2230_s8 }
  0x32   : > { %p2769_p8 = pnand %p2233_p5, %p167_p1  ;;  %s160_s23 = scalar_lea.hbm %s3267_s1, %s2270_s12 }
  0x33   : > { %s162_s27 = sshll.u32 %s154_s24, 4  ;;  %s151_s25 = scalar_lea.sflag [#allocation6], %s2742_s7  ;;  %s163_s27 = int_to_ptr.vmem [resolvable:$true] %s162_s27 }
  0x34   : > { %s2454_s0 = scalar_lea.vmem %s163_s27, 256  ;;  %s2596_s26 = smov [#allocation5]  }
  0x35   : > { %p2455_p3 = scmp.ne.s32.totalorder %s163_s27, %s2454_s0  ;;  %s2459_s29 = sshll.u32 %s2596_s26, 4  ;;  %s2460_s29 = int_to_ptr.vmem [resolvable:$false] %s2459_s29 }
  0x36   : > { %s2461_s30 = scalar_lea.vmem %s2460_s29, 512  ;;  %p2462_p5 = scmp.lt.s32.totalorder %s163_s27, %s2460_s29 }
  0x37   : > { %p2457_p9 = pnand %p2455_p3, %p2415_p6  ;;  %p2463_p11 = scmp.lt.s32.totalorder %s2461_s30, %s2454_s0 }
  0x39   : > { %p2458_p10 = pneg %p2457_p9  ;;  %p2464_p13 = por %p2463_p11, %p2462_p5 }
  0x3b   : > { %p2465_p0 = pnand %p2464_p13, %p2458_p10 }
  0x3d   : > { %2468 = shalt.err (!%p2465_p0)
}
  0x3e   : > { %2289 = dma.hbm_to_vmem [thread:$0]  (!%p2748_p4), %s160_s23, 256, %s163_s27, %s151_s25  }
  0x3f   : > { %171 = sbr.rel (%p2769_p8) target bundleno = 880 (0x370), region = 28  ;;  %s173_s7 = sand.u32 (!%p2769_p8), 1, %s2569_s13  }
  0x40   : > { %s2273_s8 = smul.u32 (!%p2769_p8), 12, %s173_s7  ;;  %s174_s12 = scalar_lea.sflag (!%p2769_p8), [#allocation3], %s173_s7 }
  0x42   : > { %s2785_s17 = scalar_lea.vmem (!%p2769_p8), [#allocation2], %s2273_s8 }
  0x44   : > { %2540 = dma.done.wait (%p2716_p7), %s174_s12, 192  }
  0x45   : > { %2542 = vsyncadd (%p2716_p7), %s174_s12, 4294967104  ;;  %s2234_s0 = sshll.u32 %s173_s7, 4  ;;  %s183_s22 = scalar_lea.sflag [#allocation6], %s173_s7 }
  0x46   : > { %s2791_s20 = scalar_lea.vmem [#allocation5], %s2234_s0 }
  0x47   : > { %2544 = dma.done.wait (%p2716_p7), %s183_s22, 256  }
  0x48   : > { %2546 = vsyncadd (%p2716_p7), %s183_s22, 4294967040  ;;  %s209_s21 = sand.u32 1, %s2557_s10   ;;  %p2235_p4 = scmp.ne.s32.totalorder %s2577_s15, 0 }
  0x49   : > { %s2274_s23 = smul.u32 24, %s209_s21  ;;  %s2597_s28 = smov (!%p2235_p4), 126  }
  0x4a   : > { %215 = sbr.rel (%p2235_p4) target bundleno = 274 (0x112), region = 40  ;;  %s2598_s27 = smov (!%p2235_p4), 127  }
  0x4b   : > { %s2800_s24 = scalar_lea.vmem [#allocation7], %s2274_s23  ;;  %s2600_s25 = smov (!%p2235_p4), 125  }
  0x4c   : > { %s2601_s26 = smov (!%p2235_p4), 124   ;;  %s2602_s29 = smov (!%p2235_p4), 108  }
  0x4d   : > { %s2603_s30 = smov (!%p2235_p4), 107   ;;  %s2604_s7 = smov (!%p2235_p4), 106  }
  0x4f   : > { %v356_v0 = vld [vmem:[%s2791_s20] sm:$0xff]  ;;  %v217_v2 = vld [vmem:[%s2785_s17 + $0x8] sm:$0xf]  ;;  %v219_v3 = vld [vmem:[%s2791_s20 + $0x8] sm:$0xf]  ;;  %vm225_vm0 = vcmask 1043456   ;;  %v254_v20 = vlaneseq }
  0x50   : > { %v2805_v1 = vld [vmem:[%s2785_s17] sm:$0xff]  ;;  %360 = vrot.lane.b32.xlu1 %v356_v0, %s2597_s28  ;;  %286 = vrot.lane.b32.xlu0 %v356_v0, %s2598_s27  ;;  %v221_v6 = vmul.f32 %v219_v3, %v217_v2  ;;  %v2599_v18 = vmov 1966171168   ;;  %vm367_vm2 = vcmask 1031168   ;;  %v355_v44 = vld [vmem:[%s2785_s17 + $0x8] sm:$0xf] }
  0x51   : > { %v220_v4 = vmul.f32 %v356_v0, %v2805_v1  ;;  %v357_v5 = vld [vmem:[%s2791_s20 + $0x8] sm:$0xff]  ;;  %v252_v19 = vunpack.c.l.s4 %v2599_v18  ;;  %v255_v28 = vshrl.u32 %v254_v20, 7  ;;  %vm2819_vm1 = vcmp.lt.s32.totalorder %v254_v20, 384 }
  0x52   : > { %v240_v10 = vsel %vm225_vm0, %v221_v6, 0.0  ;;  %vm293_vm3 = vcmask 1039360   ;;  %v281_v49 = vld [vmem:[%s2785_s17 + $0x8] sm:$0xf]  ;;  %vm441_vm4 = vcmask 1022976   ;;  %vm515_vm5 = vcmask 1014784  }
  0x53   : > { %v223_v7 = vcombine.high %v220_v4, %v220_v4  ;;  %v226_v8 = vsel %vm225_vm0, %v220_v4, 0.0  ;;  %v241_v12 = vrot.slane %v240_v10, 4  ;;  %v253_v27 = vunpack.c.0.s8 %v252_v19 }
  0x54   : > { %v227_v9 = vrot.slane %v226_v8, 4  ;;  %362 = vrot.lane.b32.xlu1 %v357_v5, %s2597_s28  ;;  %288 = vrot.lane.b32.xlu0 %v357_v5, %s2598_s27  ;;  %vm589_vm6 = vcmask 883712   ;;  %vm663_vm7 = vcmask 875520   ;;  %vm737_vm8 = vcmask 867328  }
  0x55   : > { %v233_v11 = vsel %vm225_vm0, %v223_v7, 0.0  ;;  %v242_v15 = vadd.f32 %v241_v12, %v240_v10  ;;  %v2814_v34 = vsub.s32 %v253_v27, %v255_v28 }
  0x56   : > { %v228_v13 = vadd.f32 %v227_v9, %v226_v8  ;;  %v234_v14 = vrot.slane %v233_v11, 4 }
  0x57   : > { %v243_v21 = vrot.slane %v242_v15, 2 }
  0x58   : > { %v229_v16 = vrot.slane %v228_v13, 2  ;;  %v235_v17 = vadd.f32 %v234_v14, %v233_v11  ;;  %436 = vrot.lane.b32.xlu1 %v357_v5, %s2600_s25  ;;  %434 = vrot.lane.b32.xlu0 %v356_v0, %s2600_s25  ;;  %v429_v11 = vld [vmem:[%s2785_s17 + $0x8] sm:$0xf] }
  0x59   : > { %v244_v24 = vadd.f32 %v243_v21, %v242_v15 }
  0x5a   : > { %v230_v22 = vadd.f32 %v229_v16, %v228_v13  ;;  %v236_v23 = vrot.slane %v235_v17, 2 }
  0x5b   : > { %v245_v29 = vrot.slane %v244_v24, 1 }
  0x5c   : > { %v231_v25 = vrot.slane %v230_v22, 1  ;;  %v237_v26 = vadd.f32 %v236_v23, %v235_v17  ;;  %510 = vrot.lane.b32.xlu1 %v357_v5, %s2601_s26  ;;  %508 = vrot.lane.b32.xlu0 %v356_v0, %s2601_s26 }
  0x5d   : > { %v246_v32 = vadd.f32 %v245_v29, %v244_v24 }
  0x5e   : > { %v232_v30 = vadd.f32 %v231_v25, %v230_v22  ;;  %v238_v31 = vrot.slane %v237_v26, 1 }
  0x5f   : > { %v264_v36 = vrot.slane %v246_v32, %v2814_v34 }
  0x60   : > { %v239_v33 = vadd.f32 %v238_v31, %v237_v26  ;;  %584 = vrot.lane.b32.xlu1 %v357_v5, %s2602_s29  ;;  %582 = vrot.lane.b32.xlu0 %v356_v0, %s2602_s29 }
  0x62   : > { %v250_v35 = vcombine.low %v232_v30, %v239_v33 }
  0x64   : > { %v257_v37 = vrot.slane %v250_v35, %v2814_v34  ;;  %658 = vrot.lane.b32.xlu1 %v357_v5, %s2603_s30  ;;  %656 = vrot.lane.b32.xlu0 %v356_v0, %s2603_s30 }
  0x66   : > { %v265_v38 = vcombine.low %v257_v37, %v264_v36 }
  0x68   : > { %v272_v39 = vrot.slane %v265_v38, %v2814_v34  ;;  %732 = vrot.lane.b32.xlu1 %v357_v5, %s2604_s7  ;;  %730 = vrot.lane.b32.xlu0 %v356_v0, %s2604_s7 }
  0x6a   : > { %278 = vst.msk [vmem:[%s2800_s24] ss:$8 sm:$0x7] %vm2819_vm1, %v272_v39 }
  0xc2   : > { %v361_v41 = vpop.permute.xlu1 %360  ;;  %v287_v42 = vpop.permute.xlu0 %286 }
  0xc3   : > { %v364_v46 = vrot.slane %v361_v41, 4  ;;  %v290_v47 = vrot.slane %v287_v42, 4 }
  0xc6   : > { %v363_v43 = vpop.permute.xlu1 %362  ;;  %v289_v45 = vpop.permute.xlu0 %288 }
  0xc7   : > { %v365_v48 = vrot.slane %v363_v43, 4  ;;  %v291_v50 = vrot.slane %v289_v45, 4 }
  0xc9   : > { %v366_v51 = vsel %vm225_vm0, %v364_v46, %v365_v48  ;;  %v369_v52 = vsel %vm367_vm2, %v363_v43, %v365_v48  ;;  %v292_v53 = vsel %vm225_vm0, %v290_v47, %v291_v50  ;;  %v295_v54 = vsel %vm293_vm3, %v289_v45, %v291_v50 }
  0xca   : > { %v368_v55 = vsel %vm367_vm2, %v361_v41, %v366_v51  ;;  %v373_v56 = vmul.f32 %v369_v52, %v355_v44  ;;  %v294_v57 = vsel %vm293_vm3, %v287_v42, %v292_v53  ;;  %v299_v58 = vmul.f32 %v295_v54, %v281_v49  ;;  %v437_v59 = vpop.permute.xlu1 %436  ;;  %v435_v60 = vpop.permute.xlu0 %434 }
  0xcb   : > { %v372_v61 = vmul.f32 %v368_v55, %v2805_v1  ;;  %v298_v62 = vmul.f32 %v294_v57, %v2805_v1  ;;  %v439_v63 = vrot.slane %v437_v59, 4  ;;  %v438_v3 = vrot.slane %v435_v60, 4 }
  0xcc   : > { %v391_v0 = vsel %vm225_vm0, %v373_v56, 0.0  ;;  %v317_v2 = vsel %vm225_vm0, %v299_v58, 0.0 }
  0xcd   : > { %v375_v4 = vcombine.high %v372_v61, %v372_v61  ;;  %v377_v5 = vsel %vm225_vm0, %v372_v61, 0.0  ;;  %v392_v6 = vrot.slane %v391_v0, 4  ;;  %v301_v7 = vcombine.high %v298_v62, %v298_v62 }
  0xce   : > { %v378_v8 = vrot.slane %v377_v5, 4  ;;  %v303_v9 = vsel %vm225_vm0, %v298_v62, 0.0  ;;  %v318_v10 = vrot.slane %v317_v2, 4  ;;  %v443_v12 = vsel %vm441_vm4, %v437_v59, %v439_v63  ;;  %v511_v38 = vpop.permute.xlu1 %510  ;;  %v509_v56 = vpop.permute.xlu0 %508 }
  0xcf   : > { %v384_v13 = vsel %vm225_vm0, %v375_v4, 0.0  ;;  %v393_v14 = vadd.f32 %v392_v6, %v391_v0  ;;  %v304_v15 = vrot.slane %v303_v9, 4  ;;  %v310_v16 = vsel %vm225_vm0, %v301_v7, 0.0 }
  0xd0   : > { %v379_v17 = vadd.f32 %v378_v8, %v377_v5  ;;  %v385_v18 = vrot.slane %v384_v13, 4  ;;  %v311_v19 = vrot.slane %v310_v16, 4  ;;  %v319_v20 = vadd.f32 %v318_v10, %v317_v2 }
  0xd1   : > { %v394_v21 = vrot.slane %v393_v14, 2  ;;  %v305_v22 = vadd.f32 %v304_v15, %v303_v9  ;;  %v447_v23 = vmul.f32 %v443_v12, %v429_v11  ;;  %v440_v24 = vsel %vm225_vm0, %v438_v3, %v439_v63  ;;  %v503_v11 = vld [vmem:[%s2785_s17 + $0x8] sm:$0xf] }
  0xd2   : > { %v380_v25 = vrot.slane %v379_v17, 2  ;;  %v386_v26 = vadd.f32 %v385_v18, %v384_v13  ;;  %v312_v27 = vadd.f32 %v311_v19, %v310_v16  ;;  %v320_v28 = vrot.slane %v319_v20, 2  ;;  %v585_v2 = vpop.permute.xlu1 %584 }
  0xd3   : > { %v395_v29 = vadd.f32 %v394_v21, %v393_v14  ;;  %v306_v30 = vrot.slane %v305_v22, 2  ;;  %v465_v31 = vsel %vm225_vm0, %v447_v23, 0.0  ;;  %v442_v32 = vsel %vm441_vm4, %v435_v60, %v440_v24  ;;  %v583_v21 = vpop.permute.xlu0 %582 }
  0xd4   : > { %v381_v33 = vadd.f32 %v380_v25, %v379_v17  ;;  %v387_v35 = vrot.slane %v386_v26, 2  ;;  %v313_v36 = vrot.slane %v312_v27, 2  ;;  %v321_v37 = vadd.f32 %v320_v28, %v319_v20  ;;  %v577_v20 = vld [vmem:[%s2785_s17 + $0x8] sm:$0xf] }
  0xd5   : > { %v396_v39 = vrot.slane %v395_v29, 1  ;;  %v307_v41 = vadd.f32 %v306_v30, %v305_v22  ;;  %v466_v42 = vrot.slane %v465_v31, 4  ;;  %v446_v43 = vmul.f32 %v442_v32, %v2805_v1 }
  0xd6   : > { %v382_v44 = vrot.slane %v381_v33, 1  ;;  %v388_v45 = vadd.f32 %v387_v35, %v386_v26  ;;  %v314_v46 = vadd.f32 %v313_v36, %v312_v27  ;;  %v322_v47 = vrot.slane %v321_v37, 1 }
  0xd7   : > { %v397_v48 = vadd.f32 %v396_v39, %v395_v29  ;;  %v308_v49 = vrot.slane %v307_v41, 1  ;;  %v467_v50 = vadd.f32 %v466_v42, %v465_v31  ;;  %v449_v51 = vcombine.high %v446_v43, %v446_v43  ;;  %v659_v39 = vpop.permute.xlu1 %658 }
  0xd8   : > { %v383_v52 = vadd.f32 %v382_v44, %v381_v33  ;;  %v389_v53 = vrot.slane %v388_v45, 1  ;;  %v315_v54 = vrot.slane %v314_v46, 1  ;;  %v323_v55 = vadd.f32 %v322_v47, %v321_v37 }
  0xd9   : > { %v415_v57 = vrot.slane %v397_v48, %v2814_v34  ;;  %v309_v58 = vadd.f32 %v308_v49, %v307_v41  ;;  %v468_v59 = vrot.slane %v467_v50, 2  ;;  %v451_v60 = vsel %vm225_vm0, %v446_v43, 0.0  ;;  %v657_v49 = vpop.permute.xlu0 %656 }
  0xda   : > { %v390_v61 = vadd.f32 %v389_v53, %v388_v45  ;;  %v316_v62 = vadd.f32 %v315_v54, %v314_v46  ;;  %v341_v63 = vrot.slane %v323_v55, %v2814_v34  ;;  %v452_v0 = vrot.slane %v451_v60, 4 }
  0xdb   : > { %v469_v3 = vadd.f32 %v468_v59, %v467_v50  ;;  %v458_v4 = vsel %vm225_vm0, %v449_v51, 0.0  ;;  %v513_v5 = vrot.slane %v511_v38, 4  ;;  %v512_v6 = vrot.slane %v509_v56, 4 }
  0xdc   : > { %v401_v7 = vcombine.low %v383_v52, %v390_v61  ;;  %v327_v8 = vcombine.low %v309_v58, %v316_v62  ;;  %v453_v9 = vadd.f32 %v452_v0, %v451_v60  ;;  %v459_v10 = vrot.slane %v458_v4, 4  ;;  %v651_v58 = vld [vmem:[%s2785_s17 + $0x8] sm:$0xf] }
  0xdd   : > { %v470_v12 = vrot.slane %v469_v3, 1  ;;  %v517_v13 = vsel %vm515_vm5, %v511_v38, %v513_v5  ;;  %v514_v14 = vsel %vm225_vm0, %v512_v6, %v513_v5  ;;  %v587_v15 = vrot.slane %v585_v2, 4 }
  0xde   : > { %v408_v16 = vrot.slane %v401_v7, %v2814_v34  ;;  %v334_v17 = vrot.slane %v327_v8, %v2814_v34  ;;  %v454_v18 = vrot.slane %v453_v9, 2  ;;  %v460_v19 = vadd.f32 %v459_v10, %v458_v4 }
  0xdf   : > { %v471_v22 = vadd.f32 %v470_v12, %v469_v3  ;;  %v521_v23 = vmul.f32 %v517_v13, %v503_v11  ;;  %v516_v24 = vsel %vm515_vm5, %v509_v56, %v514_v14  ;;  %v591_v25 = vsel %vm589_vm6, %v585_v2, %v587_v15 }
  0xe0   : > { %v416_v26 = vcombine.low %v408_v16, %v415_v57  ;;  %v342_v27 = vcombine.low %v334_v17, %v341_v63  ;;  %v455_v28 = vadd.f32 %v454_v18, %v453_v9  ;;  %v461_v29 = vrot.slane %v460_v19, 2 }
  0xe1   : > { %v489_v30 = vrot.slane %v471_v22, %v2814_v34  ;;  %v539_v31 = vsel %vm225_vm0, %v521_v23, 0.0  ;;  %v520_v32 = vmul.f32 %v516_v24, %v2805_v1  ;;  %v595_v33 = vmul.f32 %v591_v25, %v577_v20  ;;  %v733_v25 = vpop.permute.xlu1 %732 }
  0xe2   : > { %v423_v35 = vrot.slane %v416_v26, %v2814_v34  ;;  %v349_v36 = vrot.slane %v342_v27, %v2814_v34  ;;  %v456_v37 = vrot.slane %v455_v28, 1  ;;  %v462_v38 = vadd.f32 %v461_v29, %v460_v19  ;;  %v731_v26 = vpop.permute.xlu0 %730 }
  0xe3   : > { %v540_v41 = vrot.slane %v539_v31, 4  ;;  %v523_v42 = vcombine.high %v520_v32, %v520_v32  ;;  %v525_v43 = vsel %vm225_vm0, %v520_v32, 0.0  ;;  %v613_v44 = vsel %vm225_vm0, %v595_v33, 0.0 }
  0xe4   : > { %2237 = vst.msk [vmem:[%s2800_s24 + $0x2] ss:$8 sm:$0x7] %vm2819_vm1, %v423_v35  ;;  %2236 = vst.msk [vmem:[%s2800_s24 + $0x1] ss:$8 sm:$0x7] %vm2819_vm1, %v349_v36  ;;  %v457_v45 = vadd.f32 %v456_v37, %v455_v28 }
  0xe5   : > { %v463_v46 = vrot.slane %v462_v38, 1  ;;  %v526_v47 = vrot.slane %v525_v43, 4  ;;  %v614_v48 = vrot.slane %v613_v44, 4  ;;  %v541_v50 = vadd.f32 %v540_v41, %v539_v31 }
  0xe6   : > { %v532_v51 = vsel %vm225_vm0, %v523_v42, 0.0  ;;  %v586_v52 = vrot.slane %v583_v21, 4  ;;  %v661_v53 = vrot.slane %v659_v39, 4  ;;  %v660_v62 = vrot.slane %v657_v49, 4 }
  0xe7   : > { %v464_v54 = vadd.f32 %v463_v46, %v462_v38  ;;  %v527_v55 = vadd.f32 %v526_v47, %v525_v43  ;;  %v533_v56 = vrot.slane %v532_v51, 4  ;;  %v615_v57 = vadd.f32 %v614_v48, %v613_v44  ;;  %v725_v38 = vld [vmem:[%s2785_s17 + $0x8] sm:$0xf] }
  0xe8   : > { %v542_v59 = vrot.slane %v541_v50, 2  ;;  %v588_v60 = vsel %vm225_vm0, %v586_v52, %v587_v15  ;;  %v665_v61 = vsel %vm663_vm7, %v659_v39, %v661_v53  ;;  %v662_v7 = vsel %vm225_vm0, %v660_v62, %v661_v53 }
  0xe9   : > { %v475_v63 = vcombine.low %v457_v45, %v464_v54  ;;  %v528_v0 = vrot.slane %v527_v55, 2  ;;  %v534_v2 = vadd.f32 %v533_v56, %v532_v51  ;;  %v616_v3 = vrot.slane %v615_v57, 2 }
  0xea   : > { %v543_v4 = vadd.f32 %v542_v59, %v541_v50  ;;  %v590_v5 = vsel %vm589_vm6, %v583_v21, %v588_v60  ;;  %v669_v6 = vmul.f32 %v665_v61, %v651_v58  ;;  %v664_v21 = vsel %vm663_vm7, %v657_v49, %v662_v7 }
  0xeb   : > { %v482_v8 = vrot.slane %v475_v63, %v2814_v34  ;;  %v529_v9 = vadd.f32 %v528_v0, %v527_v55  ;;  %v535_v10 = vrot.slane %v534_v2, 2  ;;  %v617_v11 = vadd.f32 %v616_v3, %v615_v57 }
  0xec   : > { %v544_v12 = vrot.slane %v543_v4, 1  ;;  %v594_v13 = vmul.f32 %v590_v5, %v2805_v1  ;;  %v687_v14 = vsel %vm225_vm0, %v669_v6, 0.0  ;;  %v668_v35 = vmul.f32 %v664_v21, %v2805_v1 }
  0xed   : > { %v490_v15 = vcombine.low %v482_v8, %v489_v30  ;;  %v530_v16 = vrot.slane %v529_v9, 1  ;;  %v536_v17 = vadd.f32 %v535_v10, %v534_v2  ;;  %v688_v20 = vrot.slane %v687_v14, 4 }
  0xee   : > { %v597_v18 = vcombine.high %v594_v13, %v594_v13  ;;  %v599_v19 = vsel %vm225_vm0, %v594_v13, 0.0  ;;  %v618_v24 = vrot.slane %v617_v11, 1  ;;  %v545_v27 = vadd.f32 %v544_v12, %v543_v4 }
  0xef   : > { %v497_v22 = vrot.slane %v490_v15, %v2814_v34  ;;  %v537_v23 = vrot.slane %v536_v17, 1  ;;  %v600_v28 = vrot.slane %v599_v19, 4  ;;  %v689_v30 = vadd.f32 %v688_v20, %v687_v14 }
  0xf0   : > { %v606_v29 = vsel %vm225_vm0, %v597_v18, 0.0  ;;  %v531_v31 = vadd.f32 %v530_v16, %v529_v9  ;;  %v735_v39 = vrot.slane %v733_v25, 4  ;;  %v734_v41 = vrot.slane %v731_v26, 4 }
  0xf1   : > { %2238 = vst.msk [vmem:[%s2800_s24 + $0x3] ss:$8 sm:$0x7] %vm2819_vm1, %v497_v22  ;;  %v538_v32 = vadd.f32 %v537_v23, %v536_v17  ;;  %v607_v33 = vrot.slane %v606_v29, 4  ;;  %v601_v36 = vadd.f32 %v600_v28, %v599_v19  ;;  %v690_v37 = vrot.slane %v689_v30, 2 }
  0xf2   : > { %v671_v44 = vcombine.high %v668_v35, %v668_v35  ;;  %v673_v45 = vsel %vm225_vm0, %v668_v35, 0.0  ;;  %v563_v46 = vrot.slane %v545_v27, %v2814_v34  ;;  %v739_v49 = vsel %vm737_vm8, %v733_v25, %v735_v39 }
  0xf3   : > { %v549_v42 = vcombine.low %v531_v31, %v538_v32  ;;  %v608_v43 = vadd.f32 %v607_v33, %v606_v29  ;;  %v602_v47 = vrot.slane %v601_v36, 2  ;;  %v674_v48 = vrot.slane %v673_v45, 4 }
  0xf4   : > { %v680_v52 = vsel %vm225_vm0, %v671_v44, 0.0  ;;  %v743_v53 = vmul.f32 %v739_v49, %v725_v38  ;;  %v691_v55 = vadd.f32 %v690_v37, %v689_v30  ;;  %v736_v61 = vsel %vm225_vm0, %v734_v41, %v735_v39 }
  0xf5   : > { %v556_v50 = vrot.slane %v549_v42, %v2814_v34  ;;  %v609_v51 = vrot.slane %v608_v43, 2  ;;  %v603_v54 = vadd.f32 %v602_v47, %v601_v36  ;;  %v675_v56 = vadd.f32 %v674_v48, %v673_v45 }
  0xf6   : > { %v681_v57 = vrot.slane %v680_v52, 4  ;;  %v761_v60 = vsel %vm225_vm0, %v743_v53, 0.0  ;;  %v738_v5 = vsel %vm737_vm8, %v731_v26, %v736_v61  ;;  %v619_v6 = vadd.f32 %v618_v24, %v617_v11 }
  0xf7   : > { %v564_v58 = vcombine.low %v556_v50, %v563_v46  ;;  %v610_v59 = vadd.f32 %v609_v51, %v608_v43  ;;  %v604_v62 = vrot.slane %v603_v54, 1  ;;  %v676_v63 = vrot.slane %v675_v56, 2 }
  0xf8   : > { %v682_v0 = vadd.f32 %v681_v57, %v680_v52  ;;  %v762_v4 = vrot.slane %v761_v60, 4  ;;  %v692_v7 = vrot.slane %v691_v55, 1  ;;  %v742_v14 = vmul.f32 %v738_v5, %v2805_v1 }
  0xf9   : > { %v571_v2 = vrot.slane %v564_v58, %v2814_v34  ;;  %v611_v3 = vrot.slane %v610_v59, 1  ;;  %v677_v8 = vadd.f32 %v676_v63, %v675_v56  ;;  %v605_v10 = vadd.f32 %v604_v62, %v603_v54 }
  0xfa   : > { %v683_v9 = vrot.slane %v682_v0, 2  ;;  %v763_v13 = vadd.f32 %v762_v4, %v761_v60  ;;  %v745_v18 = vcombine.high %v742_v14, %v742_v14  ;;  %v747_v19 = vsel %vm225_vm0, %v742_v14, 0.0 }
  0xfb   : > { %2239 = vst.msk [vmem:[%s2800_s24 + $0x4] ss:$8 sm:$0x7] %vm2819_vm1, %v571_v2  ;;  %v612_v12 = vadd.f32 %v611_v3, %v610_v59  ;;  %v678_v15 = vrot.slane %v677_v8, 1  ;;  %v748_v11 = vrot.slane %v747_v19, 4  ;;  %v637_v22 = vrot.slane %v619_v6, %v2814_v34 }
  0xfc   : > { %v684_v16 = vadd.f32 %v683_v9, %v682_v0  ;;  %v764_v21 = vrot.slane %v763_v13, 2  ;;  %v693_v24 = vadd.f32 %v692_v7, %v691_v55  ;;  %v754_v25 = vsel %vm225_vm0, %v745_v18, 0.0 }
  0xfd   : > { %v623_v17 = vcombine.low %v605_v10, %v612_v12  ;;  %v679_v26 = vadd.f32 %v678_v15, %v677_v8  ;;  %v749_v1 = vadd.f32 %v748_v11, %v747_v19  ;;  %v755_v28 = vrot.slane %v754_v25, 4 }
  0xfe   : > { %v685_v20 = vrot.slane %v684_v16, 1  ;;  %v765_v31 = vadd.f32 %v764_v21, %v763_v13  ;;  %v711_v36 = vrot.slane %v693_v24, %v2814_v34 }
  0xff   : > { %v630_v23 = vrot.slane %v623_v17, %v2814_v34  ;;  %v750_v32 = vrot.slane %v749_v1, 2  ;;  %v756_v33 = vadd.f32 %v755_v28, %v754_v25 }
 0x100   : > { %v686_v27 = vadd.f32 %v685_v20, %v684_v16  ;;  %v766_v42 = vrot.slane %v765_v31, 1 }
 0x101   : > { %v638_v29 = vcombine.low %v630_v23, %v637_v22  ;;  %v751_v38 = vadd.f32 %v750_v32, %v749_v1  ;;  %v757_v39 = vrot.slane %v756_v33, 2 }
 0x102   : > { %v697_v30 = vcombine.low %v679_v26, %v686_v27  ;;  %v767_v47 = vadd.f32 %v766_v42, %v765_v31 }
 0x103   : > { %v645_v35 = vrot.slane %v638_v29, %v2814_v34  ;;  %v752_v43 = vrot.slane %v751_v38, 1  ;;  %v758_v44 = vadd.f32 %v757_v39, %v756_v33 }
 0x104   : > { %v704_v37 = vrot.slane %v697_v30, %v2814_v34  ;;  %v785_v51 = vrot.slane %v767_v47, %v2814_v34 }
 0x105   : > { %2240 = vst.msk [vmem:[%s2800_s24 + $0x5] ss:$8 sm:$0x7] %vm2819_vm1, %v645_v35  ;;  %v759_v46 = vrot.slane %v758_v44, 1  ;;  %v753_v48 = vadd.f32 %v752_v43, %v751_v38 }
 0x106   : > { %v712_v41 = vcombine.low %v704_v37, %v711_v36 }
 0x107   : > { %v760_v49 = vadd.f32 %v759_v46, %v758_v44 }
 0x108   : > { %v719_v45 = vrot.slane %v712_v41, %v2814_v34 }
 0x109   : > { %v771_v50 = vcombine.low %v753_v48, %v760_v49 }
 0x10a   : > { %2241 = vst.msk [vmem:[%s2800_s24 + $0x6] ss:$8 sm:$0x7] %vm2819_vm1, %v719_v45 }
 0x10b   : > { %v778_v52 = vrot.slane %v771_v50, %v2814_v34 }
 0x10d   : > { %v786_v53 = vcombine.low %v778_v52, %v785_v51 }
 0x10f   : > { %v793_v54 = vrot.slane %v786_v53, %v2814_v34 }
 0x111   : > { %2242 = vst.msk [vmem:[%s2800_s24 + $0x7] ss:$8 sm:$0x7] %vm2819_vm1, %v793_v54 }
 0x112 PF: > { %p2243_p7 = scmp.ne.s32.totalorder %s2577_s15, 1 }
 0x113   : > { %s2605_s8 = smov (!%p2243_p7), 104   ;;  %s2606_s12 = smov (!%p2243_p7), 105  }
 0x114   : > { %801 = sbr.rel (%p2243_p7) target bundleno = 486 (0x1e6), region = 44  ;;  %s2607_s0 = smov (!%p2243_p7), 88  }
 0x115   : > { %s2608_s22 = smov (!%p2243_p7), 87   ;;  %s2609_s23 = smov (!%p2243_p7), 86  }
 0x116   : > { %s2610_s28 = smov (!%p2243_p7), 85   ;;  %s2611_s27 = smov (!%p2243_p7), 84  }
 0x117   : > { %s2612_s25 = smov (!%p2243_p7), 68  }
 0x119   : > { %v882_v55 = vld [vmem:[%s2791_s20] sm:$0xff]  ;;  %v883_v56 = vld [vmem:[%s2791_s20 + $0x8] sm:$0xff]  ;;  %v2613_v57 = vmov 1966171168   ;;  %v854_v59 = vlaneseq  ;;  %vm893_vm9 = vcmask 850944   ;;  %vm814_vm10 = vcmask 1043456  }
 0x11a   : > { %886 = vrot.lane.b32.xlu1 %v882_v55, %s2605_s8  ;;  %808 = vrot.lane.b32.xlu0 %v882_v55, %s2606_s12  ;;  %v852_v58 = vunpack.c.l.s4 %v2613_v57  ;;  %v881_v61 = vld [vmem:[%s2785_s17 + $0x8] sm:$0xf]  ;;  %vm816_vm11 = vcmask 859136   ;;  %v2927_v7 = vld [vmem:[%s2785_s17] sm:$0xff]  ;;  %vm967_vm12 = vcmask 719872   ;;  %vm1041_vm13 = vcmask 711680  }
 0x11b   : > { %v803_v3 = vld [vmem:[%s2785_s17 + $0x8] sm:$0xf]  ;;  %v855_v6 = vshrl.u32 %v854_v59, 7  ;;  %vm1115_vm14 = vcmask 703488   ;;  %vm2952_vm15 = vcmp.lt.s32.totalorder %v854_v59, 384  ;;  %vm1189_vm0 = vcmask 695296  }
 0x11c   : > { %v853_v5 = vunpack.c.0.s8 %v852_v58  ;;  %v955_v31 = vld [vmem:[%s2785_s17 + $0x8] sm:$0xf]  ;;  %vm1263_vm1 = vcmask 687104   ;;  %vm1337_vm2 = vcmask 556032  }
 0x11e   : > { %888 = vrot.lane.b32.xlu1 %v883_v56, %s2605_s8  ;;  %810 = vrot.lane.b32.xlu0 %v883_v56, %s2606_s12  ;;  %v2937_v11 = vsub.s32 %v853_v5, %v855_v6 }
 0x122   : > { %962 = vrot.lane.b32.xlu1 %v883_v56, %s2607_s0  ;;  %960 = vrot.lane.b32.xlu0 %v882_v55, %s2607_s0 }
 0x126   : > { %1036 = vrot.lane.b32.xlu1 %v883_v56, %s2608_s22  ;;  %1034 = vrot.lane.b32.xlu0 %v882_v55, %s2608_s22 }
 0x12a   : > { %1110 = vrot.lane.b32.xlu1 %v883_v56, %s2609_s23  ;;  %1108 = vrot.lane.b32.xlu0 %v882_v55, %s2609_s23 }
 0x12e   : > { %1184 = vrot.lane.b32.xlu1 %v883_v56, %s2610_s28  ;;  %1182 = vrot.lane.b32.xlu0 %v882_v55, %s2610_s28 }
 0x132   : > { %1258 = vrot.lane.b32.xlu1 %v883_v56, %s2611_s27  ;;  %1256 = vrot.lane.b32.xlu0 %v882_v55, %s2611_s27 }
 0x136   : > { %1332 = vrot.lane.b32.xlu1 %v883_v56, %s2612_s25  ;;  %1330 = vrot.lane.b32.xlu0 %v882_v55, %s2612_s25 }
 0x18c   : > { %v887_v34 = vpop.permute.xlu1 %886  ;;  %v809_v40 = vpop.permute.xlu0 %808 }
 0x18d   : > { %v890_v63 = vrot.slane %v887_v34, 4  ;;  %v812_v0 = vrot.slane %v809_v40, 4 }
 0x190   : > { %v889_v60 = vpop.permute.xlu1 %888  ;;  %v811_v62 = vpop.permute.xlu0 %810 }
 0x191   : > { %v891_v2 = vrot.slane %v889_v60, 4  ;;  %v813_v4 = vrot.slane %v811_v62, 4 }
 0x193   : > { %v892_v8 = vsel %vm814_vm10, %v890_v63, %v891_v2  ;;  %v895_v9 = vsel %vm893_vm9, %v889_v60, %v891_v2  ;;  %v815_v10 = vsel %vm814_vm10, %v812_v0, %v813_v4  ;;  %v818_v12 = vsel %vm816_vm11, %v811_v62, %v813_v4 }
 0x194   : > { %v894_v13 = vsel %vm893_vm9, %v887_v34, %v892_v8  ;;  %v899_v14 = vmul.f32 %v895_v9, %v881_v61  ;;  %v817_v15 = vsel %vm816_vm11, %v809_v40, %v815_v10  ;;  %v822_v16 = vmul.f32 %v818_v12, %v803_v3  ;;  %v963_v17 = vpop.permute.xlu1 %962  ;;  %v961_v18 = vpop.permute.xlu0 %960 }
 0x195   : > { %v898_v19 = vmul.f32 %v894_v13, %v2927_v7  ;;  %v821_v20 = vmul.f32 %v2927_v7, %v817_v15  ;;  %v965_v21 = vrot.slane %v963_v17, 4  ;;  %v964_v24 = vrot.slane %v961_v18, 4 }
 0x196   : > { %v917_v22 = vsel %vm814_vm10, %v899_v14, 0.0  ;;  %v840_v23 = vsel %vm814_vm10, %v822_v16, 0.0 }
 0x197   : > { %v901_v25 = vcombine.high %v898_v19, %v898_v19  ;;  %v903_v26 = vsel %vm814_vm10, %v898_v19, 0.0  ;;  %v918_v27 = vrot.slane %v917_v22, 4  ;;  %v824_v1 = vcombine.high %v821_v20, %v821_v20 }
 0x198   : > { %v904_v28 = vrot.slane %v903_v26, 4  ;;  %v826_v29 = vsel %vm814_vm10, %v821_v20, 0.0  ;;  %v841_v30 = vrot.slane %v840_v23, 4  ;;  %v969_v32 = vsel %vm967_vm12, %v963_v17, %v965_v21  ;;  %v1037_v57 = vpop.permute.xlu1 %1036  ;;  %v1035_v14 = vpop.permute.xlu0 %1034 }
 0x199   : > { %v910_v33 = vsel %vm814_vm10, %v901_v25, 0.0  ;;  %v919_v35 = vadd.f32 %v918_v27, %v917_v22  ;;  %v827_v36 = vrot.slane %v826_v29, 4  ;;  %v833_v37 = vsel %vm814_vm10, %v824_v1, 0.0 }
 0x19a   : > { %v905_v38 = vadd.f32 %v904_v28, %v903_v26  ;;  %v911_v39 = vrot.slane %v910_v33, 4  ;;  %v834_v41 = vrot.slane %v833_v37, 4  ;;  %v842_v42 = vadd.f32 %v841_v30, %v840_v23 }
 0x19b   : > { %v920_v43 = vrot.slane %v919_v35, 2  ;;  %v828_v44 = vadd.f32 %v827_v36, %v826_v29  ;;  %v973_v45 = vmul.f32 %v969_v32, %v955_v31  ;;  %v966_v46 = vsel %vm814_vm10, %v964_v24, %v965_v21  ;;  %v1029_v31 = vld [vmem:[%s2785_s17 + $0x8] sm:$0xf] }
 0x19c   : > { %v906_v47 = vrot.slane %v905_v38, 2  ;;  %v912_v48 = vadd.f32 %v911_v39, %v910_v33  ;;  %v835_v49 = vadd.f32 %v834_v41, %v833_v37  ;;  %v843_v50 = vrot.slane %v842_v42, 2  ;;  %v1111_v24 = vpop.permute.xlu1 %1110 }
 0x19d   : > { %v921_v51 = vadd.f32 %v920_v43, %v919_v35  ;;  %v829_v52 = vrot.slane %v828_v44, 2  ;;  %v991_v53 = vsel %vm814_vm10, %v973_v45, 0.0  ;;  %v968_v54 = vsel %vm967_vm12, %v961_v18, %v966_v46  ;;  %v1109_v43 = vpop.permute.xlu0 %1108 }
 0x19e   : > { %v907_v55 = vadd.f32 %v906_v47, %v905_v38  ;;  %v913_v56 = vrot.slane %v912_v48, 2  ;;  %v836_v34 = vrot.slane %v835_v49, 2  ;;  %v844_v40 = vadd.f32 %v843_v50, %v842_v42  ;;  %v1103_v42 = vld [vmem:[%s2785_s17 + $0x8] sm:$0xf] }
 0x19f   : > { %v922_v58 = vrot.slane %v921_v51, 1  ;;  %v830_v60 = vadd.f32 %v829_v52, %v828_v44  ;;  %v992_v61 = vrot.slane %v991_v53, 4  ;;  %v972_v62 = vmul.f32 %v968_v54, %v2927_v7 }
 0x1a0   : > { %v908_v63 = vrot.slane %v907_v55, 1  ;;  %v914_v0 = vadd.f32 %v913_v56, %v912_v48  ;;  %v837_v2 = vadd.f32 %v836_v34, %v835_v49  ;;  %v845_v3 = vrot.slane %v844_v40, 1 }
 0x1a1   : > { %v923_v4 = vadd.f32 %v922_v58, %v921_v51  ;;  %v831_v5 = vrot.slane %v830_v60, 1  ;;  %v993_v6 = vadd.f32 %v992_v61, %v991_v53  ;;  %v975_v8 = vcombine.high %v972_v62, %v972_v62  ;;  %v1185_v58 = vpop.permute.xlu1 %1184 }
 0x1a2   : > { %v909_v9 = vadd.f32 %v908_v63, %v907_v55  ;;  %v915_v10 = vrot.slane %v914_v0, 1  ;;  %v838_v12 = vrot.slane %v837_v2, 1  ;;  %v846_v13 = vadd.f32 %v845_v3, %v844_v40 }
 0x1a3   : > { %v941_v16 = vrot.slane %v923_v4, %v2937_v11  ;;  %v832_v17 = vadd.f32 %v831_v5, %v830_v60  ;;  %v994_v18 = vrot.slane %v993_v6, 2  ;;  %v977_v19 = vsel %vm814_vm10, %v972_v62, 0.0  ;;  %v1183_v5 = vpop.permute.xlu0 %1182 }
 0x1a4   : > { %v916_v20 = vadd.f32 %v915_v10, %v914_v0  ;;  %v839_v21 = vadd.f32 %v838_v12, %v837_v2  ;;  %v864_v22 = vrot.slane %v846_v13, %v2937_v11  ;;  %v978_v23 = vrot.slane %v977_v19, 4 }
 0x1a5   : > { %v995_v25 = vadd.f32 %v994_v18, %v993_v6  ;;  %v984_v26 = vsel %vm814_vm10, %v975_v8, 0.0  ;;  %v1039_v59 = vrot.slane %v1037_v57, 4  ;;  %v1038_v27 = vrot.slane %v1035_v14, 4 }
 0x1a6   : > { %v927_v1 = vcombine.low %v909_v9, %v916_v20  ;;  %v850_v28 = vcombine.low %v832_v17, %v839_v21  ;;  %v979_v29 = vadd.f32 %v978_v23, %v977_v19  ;;  %v985_v30 = vrot.slane %v984_v26, 4  ;;  %v1177_v17 = vld [vmem:[%s2785_s17 + $0x8] sm:$0xf] }
 0x1a7   : > { %v996_v32 = vrot.slane %v995_v25, 1  ;;  %v1043_v33 = vsel %vm1041_vm13, %v1037_v57, %v1039_v59  ;;  %v1040_v35 = vsel %vm814_vm10, %v1038_v27, %v1039_v59  ;;  %v1113_v36 = vrot.slane %v1111_v24, 4 }
 0x1a8   : > { %v934_v37 = vrot.slane %v927_v1, %v2937_v11  ;;  %v857_v38 = vrot.slane %v850_v28, %v2937_v11  ;;  %v980_v39 = vrot.slane %v979_v29, 2  ;;  %v986_v41 = vadd.f32 %v985_v30, %v984_v26 }
 0x1a9   : > { %v997_v44 = vadd.f32 %v996_v32, %v995_v25  ;;  %v1047_v45 = vmul.f32 %v1043_v33, %v1029_v31  ;;  %v1042_v46 = vsel %vm1041_vm13, %v1035_v14, %v1040_v35  ;;  %v1117_v47 = vsel %vm1115_vm14, %v1111_v24, %v1113_v36 }
 0x1aa   : > { %v942_v48 = vcombine.low %v934_v37, %v941_v16  ;;  %v865_v49 = vcombine.low %v857_v38, %v864_v22  ;;  %v981_v50 = vadd.f32 %v980_v39, %v979_v29  ;;  %v987_v51 = vrot.slane %v986_v41, 2 }
 0x1ab   : > { %v1015_v52 = vrot.slane %v997_v44, %v2937_v11  ;;  %v1065_v53 = vsel %vm814_vm10, %v1047_v45, 0.0  ;;  %v1046_v54 = vmul.f32 %v1042_v46, %v2927_v7  ;;  %v1121_v55 = vmul.f32 %v1117_v47, %v1103_v42  ;;  %v1259_v47 = vpop.permute.xlu1 %1258 }
 0x1ac   : > { %v949_v56 = vrot.slane %v942_v48, %v2937_v11  ;;  %v872_v34 = vrot.slane %v865_v49, %v2937_v11  ;;  %v982_v40 = vrot.slane %v981_v50, 1  ;;  %v988_v57 = vadd.f32 %v987_v51, %v986_v41  ;;  %v1257_v48 = vpop.permute.xlu0 %1256 }
 0x1ad   : > { %v1066_v60 = vrot.slane %v1065_v53, 4  ;;  %v1049_v61 = vcombine.high %v1046_v54, %v1046_v54  ;;  %v1051_v62 = vsel %vm814_vm10, %v1046_v54, 0.0  ;;  %v1139_v63 = vsel %vm814_vm10, %v1121_v55, 0.0 }
 0x1ae   : > { %2244 = vst.msk [vmem:[%s2800_s24 + $0x1] ss:$8 sm:$0x7] %vm2952_vm15, %v949_v56  ;;  %878 = vst.msk [vmem:[%s2800_s24] ss:$8 sm:$0x7] %vm2952_vm15, %v872_v34  ;;  %v983_v0 = vadd.f32 %v982_v40, %v981_v50 }
 0x1af   : > { %v989_v2 = vrot.slane %v988_v57, 1  ;;  %v1052_v3 = vrot.slane %v1051_v62, 4  ;;  %v1140_v4 = vrot.slane %v1139_v63, 4  ;;  %v1067_v6 = vadd.f32 %v1066_v60, %v1065_v53 }
 0x1b0   : > { %v1058_v8 = vsel %vm814_vm10, %v1049_v61, 0.0  ;;  %v1112_v9 = vrot.slane %v1109_v43, 4  ;;  %v1187_v10 = vrot.slane %v1185_v58, 4  ;;  %v1186_v21 = vrot.slane %v1183_v5, 4 }
 0x1b1   : > { %v990_v12 = vadd.f32 %v989_v2, %v988_v57  ;;  %v1053_v13 = vadd.f32 %v1052_v3, %v1051_v62  ;;  %v1059_v14 = vrot.slane %v1058_v8, 4  ;;  %v1141_v16 = vadd.f32 %v1140_v4, %v1139_v63  ;;  %v1251_v57 = vld [vmem:[%s2785_s17 + $0x8] sm:$0xf] }
 0x1b2   : > { %v1068_v18 = vrot.slane %v1067_v6, 2  ;;  %v1114_v19 = vsel %vm814_vm10, %v1112_v9, %v1113_v36  ;;  %v1191_v20 = vsel %vm1189_vm0, %v1185_v58, %v1187_v10  ;;  %v1188_v1 = vsel %vm814_vm10, %v1186_v21, %v1187_v10 }
 0x1b3   : > { %v1001_v22 = vcombine.low %v983_v0, %v990_v12  ;;  %v1054_v23 = vrot.slane %v1053_v13, 2  ;;  %v1060_v24 = vadd.f32 %v1059_v14, %v1058_v8  ;;  %v1142_v25 = vrot.slane %v1141_v16, 2 }
 0x1b4   : > { %v1069_v26 = vadd.f32 %v1068_v18, %v1067_v6  ;;  %v1116_v59 = vsel %vm1115_vm14, %v1109_v43, %v1114_v19  ;;  %v1195_v27 = vmul.f32 %v1191_v20, %v1177_v17  ;;  %v1190_v43 = vsel %vm1189_vm0, %v1183_v5, %v1188_v1 }
 0x1b5   : > { %v1008_v28 = vrot.slane %v1001_v22, %v2937_v11  ;;  %v1055_v29 = vadd.f32 %v1054_v23, %v1053_v13  ;;  %v1061_v30 = vrot.slane %v1060_v24, 2  ;;  %v1143_v31 = vadd.f32 %v1142_v25, %v1141_v16  ;;  %v1333_v25 = vpop.permute.xlu1 %1332 }
 0x1b6   : > { %v1070_v32 = vrot.slane %v1069_v26, 1  ;;  %v1120_v33 = vmul.f32 %v1116_v59, %v2927_v7  ;;  %v1213_v35 = vsel %vm814_vm10, %v1195_v27, 0.0  ;;  %v1194_v56 = vmul.f32 %v1190_v43, %v2927_v7 }
 0x1b7   : > { %v1016_v36 = vcombine.low %v1008_v28, %v1015_v52  ;;  %v1056_v37 = vrot.slane %v1055_v29, 1  ;;  %v1062_v38 = vadd.f32 %v1061_v30, %v1060_v24  ;;  %v1214_v42 = vrot.slane %v1213_v35, 4  ;;  %v1331_v28 = vpop.permute.xlu0 %1330 }
 0x1b8   : > { %v1123_v39 = vcombine.high %v1120_v33, %v1120_v33  ;;  %v1125_v41 = vsel %vm814_vm10, %v1120_v33, 0.0  ;;  %v1144_v46 = vrot.slane %v1143_v31, 1  ;;  %v1071_v49 = vadd.f32 %v1070_v32, %v1069_v26 }
 0x1b9   : > { %v1023_v44 = vrot.slane %v1016_v36, %v2937_v11  ;;  %v1063_v45 = vrot.slane %v1062_v38, 1  ;;  %v1126_v50 = vrot.slane %v1125_v41, 4  ;;  %v1215_v52 = vadd.f32 %v1214_v42, %v1213_v35  ;;  %v1325_v42 = vld [vmem:[%s2785_s17 + $0x8] sm:$0xf] }
 0x1ba   : > { %v1132_v51 = vsel %vm814_vm10, %v1123_v39, 0.0  ;;  %v1057_v53 = vadd.f32 %v1056_v37, %v1055_v29  ;;  %v1261_v58 = vrot.slane %v1259_v47, 4  ;;  %v1260_v60 = vrot.slane %v1257_v48, 4 }
 0x1bb   : > { %2245 = vst.msk [vmem:[%s2800_s24 + $0x2] ss:$8 sm:$0x7] %vm2952_vm15, %v1023_v44  ;;  %v1064_v54 = vadd.f32 %v1063_v45, %v1062_v38  ;;  %v1133_v55 = vrot.slane %v1132_v51, 4  ;;  %v1127_v34 = vadd.f32 %v1126_v50, %v1125_v41  ;;  %v1216_v40 = vrot.slane %v1215_v52, 2 }
 0x1bc   : > { %v1197_v63 = vcombine.high %v1194_v56, %v1194_v56  ;;  %v1199_v0 = vsel %vm814_vm10, %v1194_v56, 0.0  ;;  %v1089_v2 = vrot.slane %v1071_v49, %v2937_v11  ;;  %v1265_v5 = vsel %vm1263_vm1, %v1259_v47, %v1261_v58 }
 0x1bd   : > { %v1075_v61 = vcombine.low %v1057_v53, %v1064_v54  ;;  %v1134_v62 = vadd.f32 %v1133_v55, %v1132_v51  ;;  %v1128_v3 = vrot.slane %v1127_v34, 2  ;;  %v1200_v4 = vrot.slane %v1199_v0, 4 }
 0x1be   : > { %v1206_v9 = vsel %vm814_vm10, %v1197_v63, 0.0  ;;  %v1269_v10 = vmul.f32 %v1265_v5, %v1251_v57  ;;  %v1217_v13 = vadd.f32 %v1216_v40, %v1215_v52  ;;  %v1262_v20 = vsel %vm814_vm10, %v1260_v60, %v1261_v58 }
 0x1bf   : > { %v1082_v6 = vrot.slane %v1075_v61, %v2937_v11  ;;  %v1135_v8 = vrot.slane %v1134_v62, 2  ;;  %v1129_v12 = vadd.f32 %v1128_v3, %v1127_v34  ;;  %v1201_v14 = vadd.f32 %v1200_v4, %v1199_v0 }
 0x1c0   : > { %v1207_v16 = vrot.slane %v1206_v9, 4  ;;  %v1287_v19 = vsel %vm814_vm10, %v1269_v10, 0.0  ;;  %v1145_v21 = vadd.f32 %v1144_v46, %v1143_v31  ;;  %v1264_v1 = vsel %vm1263_vm1, %v1257_v48, %v1262_v20 }
 0x1c1   : > { %v1090_v17 = vcombine.low %v1082_v6, %v1089_v2  ;;  %v1136_v18 = vadd.f32 %v1135_v8, %v1134_v62  ;;  %v1130_v22 = vrot.slane %v1129_v12, 1  ;;  %v1202_v23 = vrot.slane %v1201_v14, 2 }
 0x1c2   : > { %v1208_v24 = vadd.f32 %v1207_v16, %v1206_v9  ;;  %v1288_v27 = vrot.slane %v1287_v19, 4  ;;  %v1218_v30 = vrot.slane %v1217_v13, 1  ;;  %v1268_v36 = vmul.f32 %v1264_v1, %v2927_v7 }
 0x1c3   : > { %v1097_v26 = vrot.slane %v1090_v17, %v2937_v11  ;;  %v1137_v59 = vrot.slane %v1136_v18, 1  ;;  %v1131_v29 = vadd.f32 %v1130_v22, %v1129_v12  ;;  %v1203_v32 = vadd.f32 %v1202_v23, %v1201_v14 }
 0x1c4   : > { %v1209_v33 = vrot.slane %v1208_v24, 2  ;;  %v1289_v35 = vadd.f32 %v1288_v27, %v1287_v19  ;;  %v1335_v37 = vrot.slane %v1333_v25, 4  ;;  %v1163_v38 = vrot.slane %v1145_v21, %v2937_v11 }
 0x1c5   : > { %2246 = vst.msk [vmem:[%s2800_s24 + $0x3] ss:$8 sm:$0x7] %vm2952_vm15, %v1097_v26  ;;  %v1138_v31 = vadd.f32 %v1137_v59, %v1136_v18  ;;  %v1204_v39 = vrot.slane %v1203_v32, 1  ;;  %v1334_v43 = vrot.slane %v1331_v28, 4  ;;  %v1271_v46 = vcombine.high %v1268_v36, %v1268_v36 }
 0x1c6   : > { %v1210_v41 = vadd.f32 %v1209_v33, %v1208_v24  ;;  %v1290_v45 = vrot.slane %v1289_v35, 2  ;;  %v1273_v47 = vsel %vm814_vm10, %v1268_v36, 0.0  ;;  %v1219_v48 = vadd.f32 %v1218_v30, %v1217_v13 }
 0x1c7   : > { %v1149_v44 = vcombine.low %v1131_v29, %v1138_v31  ;;  %v1274_v50 = vrot.slane %v1273_v47, 4  ;;  %v1339_v51 = vsel %vm1337_vm2, %v1333_v25, %v1335_v37  ;;  %v1205_v53 = vadd.f32 %v1204_v39, %v1203_v32 }
 0x1c8   : > { %v1211_v49 = vrot.slane %v1210_v41, 1  ;;  %v1280_v54 = vsel %vm814_vm10, %v1271_v46, 0.0  ;;  %v1343_v55 = vmul.f32 %v1339_v51, %v1325_v42  ;;  %v1336_v57 = vsel %vm814_vm10, %v1334_v43, %v1335_v37 }
 0x1c9   : > { %v1156_v52 = vrot.slane %v1149_v44, %v2937_v11  ;;  %v1275_v34 = vadd.f32 %v1274_v50, %v1273_v47  ;;  %v1281_v40 = vrot.slane %v1280_v54, 4  ;;  %v1291_v60 = vadd.f32 %v1290_v45, %v1289_v35 }
 0x1ca   : > { %v1212_v56 = vadd.f32 %v1211_v49, %v1210_v41  ;;  %v1361_v61 = vsel %vm814_vm10, %v1343_v55, 0.0  ;;  %v1338_v62 = vsel %vm1337_vm2, %v1331_v28, %v1336_v57  ;;  %v1237_v5 = vrot.slane %v1219_v48, %v2937_v11 }
 0x1cb   : > { %v1164_v58 = vcombine.low %v1156_v52, %v1163_v38  ;;  %v1276_v0 = vrot.slane %v1275_v34, 2  ;;  %v1282_v2 = vadd.f32 %v1281_v40, %v1280_v54  ;;  %v1362_v3 = vrot.slane %v1361_v61, 4 }
 0x1cc   : > { %v1223_v63 = vcombine.low %v1205_v53, %v1212_v56  ;;  %v1342_v6 = vmul.f32 %v1338_v62, %v2927_v7  ;;  %v1292_v17 = vrot.slane %v1291_v60, 1 }
 0x1cd   : > { %v1171_v4 = vrot.slane %v1164_v58, %v2937_v11  ;;  %v1277_v9 = vadd.f32 %v1276_v0, %v1275_v34  ;;  %v1283_v10 = vrot.slane %v1282_v2, 2  ;;  %v1363_v12 = vadd.f32 %v1362_v3, %v1361_v61 }
 0x1ce   : > { %v1230_v8 = vrot.slane %v1223_v63, %v2937_v11  ;;  %v1345_v13 = vcombine.high %v1342_v6, %v1342_v6  ;;  %v1347_v14 = vsel %vm814_vm10, %v1342_v6, 0.0  ;;  %v1293_v26 = vadd.f32 %v1292_v17, %v1291_v60 }
 0x1cf   : > { %2247 = vst.msk [vmem:[%s2800_s24 + $0x4] ss:$8 sm:$0x7] %vm2952_vm15, %v1171_v4  ;;  %v1278_v18 = vrot.slane %v1277_v9, 1  ;;  %v1284_v19 = vadd.f32 %v1283_v10, %v1282_v2  ;;  %v1364_v20 = vrot.slane %v1363_v12, 2  ;;  %v1348_v21 = vrot.slane %v1347_v14, 4 }
 0x1d0   : > { %v1238_v16 = vcombine.low %v1230_v8, %v1237_v5  ;;  %v1354_v7 = vsel %vm814_vm10, %v1345_v13, 0.0  ;;  %v1311_v31 = vrot.slane %v1293_v26, %v2937_v11 }
 0x1d1   : > { %v1285_v23 = vrot.slane %v1284_v19, 1  ;;  %v1349_v24 = vadd.f32 %v1348_v21, %v1347_v14  ;;  %v1355_v25 = vrot.slane %v1354_v7, 4  ;;  %v1279_v59 = vadd.f32 %v1278_v18, %v1277_v9 }
 0x1d2   : > { %v1245_v22 = vrot.slane %v1238_v16, %v2937_v11  ;;  %v1365_v1 = vadd.f32 %v1364_v20, %v1363_v12 }
 0x1d3   : > { %v1286_v27 = vadd.f32 %v1285_v23, %v1284_v19  ;;  %v1350_v28 = vrot.slane %v1349_v24, 2  ;;  %v1356_v29 = vadd.f32 %v1355_v25, %v1354_v7 }
 0x1d4   : > { %2248 = vst.msk [vmem:[%s2800_s24 + $0x5] ss:$8 sm:$0x7] %vm2952_vm15, %v1245_v22  ;;  %v1366_v36 = vrot.slane %v1365_v1, 1 }
 0x1d5   : > { %v1297_v30 = vcombine.low %v1279_v59, %v1286_v27  ;;  %v1351_v32 = vadd.f32 %v1350_v28, %v1349_v24  ;;  %v1357_v33 = vrot.slane %v1356_v29, 2 }
 0x1d6   : > { %v1367_v43 = vadd.f32 %v1366_v36, %v1365_v1 }
 0x1d7   : > { %v1304_v35 = vrot.slane %v1297_v30, %v2937_v11  ;;  %v1352_v37 = vrot.slane %v1351_v32, 1  ;;  %v1358_v38 = vadd.f32 %v1357_v33, %v1356_v29 }
 0x1d8   : > { %v1385_v47 = vrot.slane %v1367_v43, %v2937_v11 }
 0x1d9   : > { %v1312_v39 = vcombine.low %v1304_v35, %v1311_v31  ;;  %v1359_v41 = vrot.slane %v1358_v38, 1  ;;  %v1353_v44 = vadd.f32 %v1352_v37, %v1351_v32 }
 0x1db   : > { %v1319_v42 = vrot.slane %v1312_v39, %v2937_v11  ;;  %v1360_v45 = vadd.f32 %v1359_v41, %v1358_v38 }
 0x1dd   : > { %2249 = vst.msk [vmem:[%s2800_s24 + $0x6] ss:$8 sm:$0x7] %vm2952_vm15, %v1319_v42  ;;  %v1371_v46 = vcombine.low %v1353_v44, %v1360_v45 }
 0x1df   : > { %v1378_v48 = vrot.slane %v1371_v46, %v2937_v11 }
 0x1e1   : > { %v1386_v49 = vcombine.low %v1378_v48, %v1385_v47 }
 0x1e3   : > { %v1393_v50 = vrot.slane %v1386_v49, %v2937_v11 }
 0x1e5   : > { %2250 = vst.msk [vmem:[%s2800_s24 + $0x7] ss:$8 sm:$0x7] %vm2952_vm15, %v1393_v50 }
 0x1e6 PF: > { %p2251_p6 = scmp.ne.s32.totalorder %s2577_s15, 2 }
 0x1e7   : > { %s2614_s26 = smov (!%p2251_p6), 66   ;;  %s2615_s29 = smov (!%p2251_p6), 67  }
 0x1e8   : > { %1401 = sbr.rel (%p2251_p6) target bundleno = 698 (0x2ba), region = 48  ;;  %s2616_s30 = smov (!%p2251_p6), 65  }
 0x1e9   : > { %s2617_s7 = smov (!%p2251_p6), 64   ;;  %s2618_s8 = smov (!%p2251_p6), 48  }
 0x1ea   : > { %s2619_s12 = smov (!%p2251_p6), 47   ;;  %s2620_s0 = smov (!%p2251_p6), 46  }
 0x1eb   : > { %s2621_s22 = smov (!%p2251_p6), 45  }
 0x1ed   : > { %v1482_v51 = vld [vmem:[%s2791_s20] sm:$0xff]  ;;  %v1483_v52 = vld [vmem:[%s2791_s20 + $0x8] sm:$0xff]  ;;  %v2622_v53 = vmov 1966171168   ;;  %v1454_v55 = vlaneseq  ;;  %vm1493_vm3 = vcmask 539648   ;;  %vm1414_vm4 = vcmask 1043456  }
 0x1ee   : > { %1486 = vrot.lane.b32.xlu1 %v1482_v51, %s2614_s26  ;;  %1408 = vrot.lane.b32.xlu0 %v1482_v51, %s2615_s29  ;;  %v1452_v54 = vunpack.c.l.s4 %v2622_v53  ;;  %v1481_v34 = vld [vmem:[%s2785_s17 + $0x8] sm:$0xf]  ;;  %vm1416_vm5 = vcmask 547840   ;;  %v3053_v2 = vld [vmem:[%s2785_s17] sm:$0xff]  ;;  %vm1567_vm6 = vcmask 531456   ;;  %vm1641_vm7 = vcmask 523264  }
 0x1ef   : > { %v1403_v61 = vld [vmem:[%s2785_s17 + $0x8] sm:$0xf]  ;;  %v1455_v0 = vshrl.u32 %v1454_v55, 7  ;;  %vm1715_vm8 = vcmask 392192   ;;  %vm3078_vm9 = vcmp.lt.s32.totalorder %v1454_v55, 384  ;;  %vm1789_vm10 = vcmask 384000  }
 0x1f0   : > { %v1453_v63 = vunpack.c.0.s8 %v1452_v54  ;;  %v1555_v1 = vld [vmem:[%s2785_s17 + $0x8] sm:$0xf]  ;;  %vm1863_vm11 = vcmask 375808   ;;  %vm1937_vm12 = vcmask 367616  }
 0x1f2   : > { %1488 = vrot.lane.b32.xlu1 %v1483_v52, %s2614_s26  ;;  %1410 = vrot.lane.b32.xlu0 %v1483_v52, %s2615_s29  ;;  %v3063_v19 = vsub.s32 %v1453_v63, %v1455_v0 }
 0x1f6   : > { %1562 = vrot.lane.b32.xlu1 %v1483_v52, %s2616_s30  ;;  %1560 = vrot.lane.b32.xlu0 %v1482_v51, %s2616_s30 }
 0x1fa   : > { %1636 = vrot.lane.b32.xlu1 %v1483_v52, %s2617_s7  ;;  %1634 = vrot.lane.b32.xlu0 %v1482_v51, %s2617_s7 }
 0x1fe   : > { %1710 = vrot.lane.b32.xlu1 %v1483_v52, %s2618_s8  ;;  %1708 = vrot.lane.b32.xlu0 %v1482_v51, %s2618_s8 }
 0x202   : > { %1784 = vrot.lane.b32.xlu1 %v1483_v52, %s2619_s12  ;;  %1782 = vrot.lane.b32.xlu0 %v1482_v51, %s2619_s12 }
 0x206   : > { %1858 = vrot.lane.b32.xlu1 %v1483_v52, %s2620_s0  ;;  %1856 = vrot.lane.b32.xlu0 %v1482_v51, %s2620_s0 }
 0x20a   : > { %1932 = vrot.lane.b32.xlu1 %v1483_v52, %s2621_s22  ;;  %1930 = vrot.lane.b32.xlu0 %v1482_v51, %s2621_s22 }
 0x260   : > { %v1487_v11 = vpop.permute.xlu1 %1486  ;;  %v1409_v15 = vpop.permute.xlu0 %1408 }
 0x261   : > { %v1490_v57 = vrot.slane %v1487_v11, 4  ;;  %v1412_v58 = vrot.slane %v1409_v15, 4 }
 0x264   : > { %v1489_v56 = vpop.permute.xlu1 %1488  ;;  %v1411_v40 = vpop.permute.xlu0 %1410 }
 0x265   : > { %v1491_v60 = vrot.slane %v1489_v56, 4  ;;  %v1413_v62 = vrot.slane %v1411_v40, 4 }
 0x267   : > { %v1492_v3 = vsel %vm1414_vm4, %v1490_v57, %v1491_v60  ;;  %v1495_v4 = vsel %vm1493_vm3, %v1489_v56, %v1491_v60  ;;  %v1415_v5 = vsel %vm1414_vm4, %v1412_v58, %v1413_v62  ;;  %v1418_v6 = vsel %vm1416_vm5, %v1411_v40, %v1413_v62 }
 0x268   : > { %v1494_v8 = vsel %vm1493_vm3, %v1487_v11, %v1492_v3  ;;  %v1499_v9 = vmul.f32 %v1495_v4, %v1481_v34  ;;  %v1417_v10 = vsel %vm1416_vm5, %v1409_v15, %v1415_v5  ;;  %v1422_v12 = vmul.f32 %v1418_v6, %v1403_v61  ;;  %v1563_v13 = vpop.permute.xlu1 %1562  ;;  %v1561_v14 = vpop.permute.xlu0 %1560 }
 0x269   : > { %v1498_v16 = vmul.f32 %v1494_v8, %v3053_v2  ;;  %v1421_v17 = vmul.f32 %v3053_v2, %v1417_v10  ;;  %v1565_v18 = vrot.slane %v1563_v13, 4  ;;  %v1564_v7 = vrot.slane %v1561_v14, 4 }
 0x26a   : > { %v1517_v20 = vsel %vm1414_vm4, %v1499_v9, 0.0  ;;  %v1440_v21 = vsel %vm1414_vm4, %v1422_v12, 0.0 }
 0x26b   : > { %v1501_v22 = vcombine.high %v1498_v16, %v1498_v16  ;;  %v1503_v23 = vsel %vm1414_vm4, %v1498_v16, 0.0  ;;  %v1518_v24 = vrot.slane %v1517_v20, 4  ;;  %v1424_v25 = vcombine.high %v1421_v17, %v1421_v17 }
 0x26c   : > { %v1504_v26 = vrot.slane %v1503_v23, 4  ;;  %v1426_v59 = vsel %vm1414_vm4, %v1421_v17, 0.0  ;;  %v1441_v27 = vrot.slane %v1440_v21, 4  ;;  %v1569_v28 = vsel %vm1567_vm6, %v1563_v13, %v1565_v18  ;;  %v1637_v53 = vpop.permute.xlu1 %1636  ;;  %v1635_v9 = vpop.permute.xlu0 %1634 }
 0x26d   : > { %v1510_v29 = vsel %vm1414_vm4, %v1501_v22, 0.0  ;;  %v1519_v30 = vadd.f32 %v1518_v24, %v1517_v20  ;;  %v1427_v32 = vrot.slane %v1426_v59, 4  ;;  %v1433_v33 = vsel %vm1414_vm4, %v1424_v25, 0.0 }
 0x26e   : > { %v1505_v31 = vadd.f32 %v1504_v26, %v1503_v23  ;;  %v1511_v35 = vrot.slane %v1510_v29, 4  ;;  %v1434_v36 = vrot.slane %v1433_v33, 4  ;;  %v1442_v37 = vadd.f32 %v1441_v27, %v1440_v21 }
 0x26f   : > { %v1520_v38 = vrot.slane %v1519_v30, 2  ;;  %v1428_v39 = vadd.f32 %v1427_v32, %v1426_v59  ;;  %v1573_v41 = vmul.f32 %v1569_v28, %v1555_v1  ;;  %v1566_v42 = vsel %vm1414_vm4, %v1564_v7, %v1565_v18  ;;  %v1629_v1 = vld [vmem:[%s2785_s17 + $0x8] sm:$0xf] }
 0x270   : > { %v1506_v43 = vrot.slane %v1505_v31, 2  ;;  %v1512_v44 = vadd.f32 %v1511_v35, %v1510_v29  ;;  %v1435_v45 = vadd.f32 %v1434_v36, %v1433_v33  ;;  %v1443_v46 = vrot.slane %v1442_v37, 2  ;;  %v1711_v7 = vpop.permute.xlu1 %1710 }
 0x271   : > { %v1521_v47 = vadd.f32 %v1520_v38, %v1519_v30  ;;  %v1429_v48 = vrot.slane %v1428_v39, 2  ;;  %v1591_v49 = vsel %vm1414_vm4, %v1573_v41, 0.0  ;;  %v1568_v50 = vsel %vm1567_vm6, %v1561_v14, %v1566_v42  ;;  %v1709_v38 = vpop.permute.xlu0 %1708 }
 0x272   : > { %v1507_v51 = vadd.f32 %v1506_v43, %v1505_v31  ;;  %v1513_v52 = vrot.slane %v1512_v44, 2  ;;  %v1436_v11 = vrot.slane %v1435_v45, 2  ;;  %v1444_v15 = vadd.f32 %v1443_v46, %v1442_v37  ;;  %v1703_v37 = vld [vmem:[%s2785_s17 + $0x8] sm:$0xf] }
 0x273   : > { %v1522_v54 = vrot.slane %v1521_v47, 1  ;;  %v1430_v56 = vadd.f32 %v1429_v48, %v1428_v39  ;;  %v1592_v34 = vrot.slane %v1591_v49, 4  ;;  %v1572_v40 = vmul.f32 %v1568_v50, %v3053_v2 }
 0x274   : > { %v1508_v57 = vrot.slane %v1507_v51, 1  ;;  %v1514_v58 = vadd.f32 %v1513_v52, %v1512_v44  ;;  %v1437_v60 = vadd.f32 %v1436_v11, %v1435_v45  ;;  %v1445_v61 = vrot.slane %v1444_v15, 1 }
 0x275   : > { %v1523_v62 = vadd.f32 %v1522_v54, %v1521_v47  ;;  %v1431_v63 = vrot.slane %v1430_v56, 1  ;;  %v1593_v0 = vadd.f32 %v1592_v34, %v1591_v49  ;;  %v1575_v3 = vcombine.high %v1572_v40, %v1572_v40  ;;  %v1785_v54 = vpop.permute.xlu1 %1784 }
 0x276   : > { %v1509_v4 = vadd.f32 %v1508_v57, %v1507_v51  ;;  %v1515_v5 = vrot.slane %v1514_v58, 1  ;;  %v1438_v6 = vrot.slane %v1437_v60, 1  ;;  %v1446_v8 = vadd.f32 %v1445_v61, %v1444_v15 }
 0x277   : > { %v1541_v12 = vrot.slane %v1523_v62, %v3063_v19  ;;  %v1432_v13 = vadd.f32 %v1431_v63, %v1430_v56  ;;  %v1594_v14 = vrot.slane %v1593_v0, 2  ;;  %v1577_v16 = vsel %vm1414_vm4, %v1572_v40, 0.0  ;;  %v1783_v63 = vpop.permute.xlu0 %1782 }
 0x278   : > { %v1516_v17 = vadd.f32 %v1515_v5, %v1514_v58  ;;  %v1439_v18 = vadd.f32 %v1438_v6, %v1437_v60  ;;  %v1464_v20 = vrot.slane %v1446_v8, %v3063_v19  ;;  %v1578_v21 = vrot.slane %v1577_v16, 4 }
 0x279   : > { %v1595_v22 = vadd.f32 %v1594_v14, %v1593_v0  ;;  %v1584_v23 = vsel %vm1414_vm4, %v1575_v3, 0.0  ;;  %v1639_v55 = vrot.slane %v1637_v53, 4  ;;  %v1638_v24 = vrot.slane %v1635_v9, 4 }
 0x27a   : > { %v1527_v25 = vcombine.low %v1509_v4, %v1516_v17  ;;  %v1450_v26 = vcombine.low %v1432_v13, %v1439_v18  ;;  %v1579_v59 = vadd.f32 %v1578_v21, %v1577_v16  ;;  %v1585_v27 = vrot.slane %v1584_v23, 4  ;;  %v1777_v13 = vld [vmem:[%s2785_s17 + $0x8] sm:$0xf] }
 0x27b   : > { %v1596_v28 = vrot.slane %v1595_v22, 1  ;;  %v1643_v29 = vsel %vm1641_vm7, %v1637_v53, %v1639_v55  ;;  %v1640_v30 = vsel %vm1414_vm4, %v1638_v24, %v1639_v55  ;;  %v1713_v32 = vrot.slane %v1711_v7, 4 }
 0x27c   : > { %v1534_v33 = vrot.slane %v1527_v25, %v3063_v19  ;;  %v1457_v31 = vrot.slane %v1450_v26, %v3063_v19  ;;  %v1580_v35 = vrot.slane %v1579_v59, 2  ;;  %v1586_v36 = vadd.f32 %v1585_v27, %v1584_v23 }
 0x27d   : > { %v1597_v39 = vadd.f32 %v1596_v28, %v1595_v22  ;;  %v1647_v41 = vmul.f32 %v1643_v29, %v1629_v1  ;;  %v1642_v42 = vsel %vm1641_vm7, %v1635_v9, %v1640_v30  ;;  %v1717_v43 = vsel %vm1715_vm8, %v1711_v7, %v1713_v32 }
 0x27e   : > { %v1542_v44 = vcombine.low %v1534_v33, %v1541_v12  ;;  %v1465_v45 = vcombine.low %v1457_v31, %v1464_v20  ;;  %v1581_v46 = vadd.f32 %v1580_v35, %v1579_v59  ;;  %v1587_v47 = vrot.slane %v1586_v36, 2 }
 0x27f   : > { %v1615_v48 = vrot.slane %v1597_v39, %v3063_v19  ;;  %v1665_v49 = vsel %vm1414_vm4, %v1647_v41, 0.0  ;;  %v1646_v50 = vmul.f32 %v1642_v42, %v3053_v2  ;;  %v1721_v51 = vmul.f32 %v1717_v43, %v1703_v37  ;;  %v1859_v43 = vpop.permute.xlu1 %1858 }
 0x280   : > { %v1549_v52 = vrot.slane %v1542_v44, %v3063_v19  ;;  %v1472_v11 = vrot.slane %v1465_v45, %v3063_v19  ;;  %v1582_v15 = vrot.slane %v1581_v46, 1  ;;  %v1588_v53 = vadd.f32 %v1587_v47, %v1586_v36  ;;  %v1857_v44 = vpop.permute.xlu0 %1856 }
 0x281   : > { %v1666_v56 = vrot.slane %v1665_v49, 4  ;;  %v1649_v34 = vcombine.high %v1646_v50, %v1646_v50  ;;  %v1651_v40 = vsel %vm1414_vm4, %v1646_v50, 0.0  ;;  %v1739_v57 = vsel %vm1414_vm4, %v1721_v51, 0.0 }
 0x282   : > { %2252 = vst.msk [vmem:[%s2800_s24 + $0x1] ss:$8 sm:$0x7] %vm3078_vm9, %v1549_v52  ;;  %1478 = vst.msk [vmem:[%s2800_s24] ss:$8 sm:$0x7] %vm3078_vm9, %v1472_v11  ;;  %v1583_v58 = vadd.f32 %v1582_v15, %v1581_v46 }
 0x283   : > { %v1589_v60 = vrot.slane %v1588_v53, 1  ;;  %v1652_v61 = vrot.slane %v1651_v40, 4  ;;  %v1740_v62 = vrot.slane %v1739_v57, 4  ;;  %v1667_v0 = vadd.f32 %v1666_v56, %v1665_v49 }
 0x284   : > { %v1658_v3 = vsel %vm1414_vm4, %v1649_v34, 0.0  ;;  %v1712_v4 = vrot.slane %v1709_v38, 4  ;;  %v1787_v5 = vrot.slane %v1785_v54, 4  ;;  %v1786_v18 = vrot.slane %v1783_v63, 4 }
 0x285   : > { %v1590_v6 = vadd.f32 %v1589_v60, %v1588_v53  ;;  %v1653_v8 = vadd.f32 %v1652_v61, %v1651_v40  ;;  %v1659_v9 = vrot.slane %v1658_v3, 4  ;;  %v1741_v12 = vadd.f32 %v1740_v62, %v1739_v57  ;;  %v1851_v53 = vld [vmem:[%s2785_s17 + $0x8] sm:$0xf] }
 0x286   : > { %v1668_v14 = vrot.slane %v1667_v0, 2  ;;  %v1714_v16 = vsel %vm1414_vm4, %v1712_v4, %v1713_v32  ;;  %v1791_v17 = vsel %vm1789_vm10, %v1785_v54, %v1787_v5  ;;  %v1788_v25 = vsel %vm1414_vm4, %v1786_v18, %v1787_v5 }
 0x287   : > { %v1601_v20 = vcombine.low %v1583_v58, %v1590_v6  ;;  %v1654_v21 = vrot.slane %v1653_v8, 2  ;;  %v1660_v7 = vadd.f32 %v1659_v9, %v1658_v3  ;;  %v1742_v22 = vrot.slane %v1741_v12, 2 }
 0x288   : > { %v1669_v23 = vadd.f32 %v1668_v14, %v1667_v0  ;;  %v1716_v55 = vsel %vm1715_vm8, %v1709_v38, %v1714_v16  ;;  %v1795_v24 = vmul.f32 %v1791_v17, %v1777_v13  ;;  %v1790_v38 = vsel %vm1789_vm10, %v1783_v63, %v1788_v25 }
 0x289   : > { %v1608_v26 = vrot.slane %v1601_v20, %v3063_v19  ;;  %v1655_v59 = vadd.f32 %v1654_v21, %v1653_v8  ;;  %v1661_v27 = vrot.slane %v1660_v7, 2  ;;  %v1743_v1 = vadd.f32 %v1742_v22, %v1741_v12  ;;  %v1933_v22 = vpop.permute.xlu1 %1932 }
 0x28a   : > { %v1670_v28 = vrot.slane %v1669_v23, 1  ;;  %v1720_v29 = vmul.f32 %v1716_v55, %v3053_v2  ;;  %v1813_v30 = vsel %vm1414_vm4, %v1795_v24, 0.0  ;;  %v1794_v52 = vmul.f32 %v1790_v38, %v3053_v2 }
 0x28b   : > { %v1616_v32 = vcombine.low %v1608_v26, %v1615_v48  ;;  %v1656_v33 = vrot.slane %v1655_v59, 1  ;;  %v1662_v31 = vadd.f32 %v1661_v27, %v1660_v7  ;;  %v1814_v37 = vrot.slane %v1813_v30, 4  ;;  %v1931_v26 = vpop.permute.xlu0 %1930 }
 0x28c   : > { %v1723_v35 = vcombine.high %v1720_v29, %v1720_v29  ;;  %v1725_v36 = vsel %vm1414_vm4, %v1720_v29, 0.0  ;;  %v1744_v42 = vrot.slane %v1743_v1, 1  ;;  %v1671_v45 = vadd.f32 %v1670_v28, %v1669_v23 }
 0x28d   : > { %v1623_v39 = vrot.slane %v1616_v32, %v3063_v19  ;;  %v1663_v41 = vrot.slane %v1662_v31, 1  ;;  %v1726_v46 = vrot.slane %v1725_v36, 4  ;;  %v1815_v48 = vadd.f32 %v1814_v37, %v1813_v30  ;;  %v1925_v37 = vld [vmem:[%s2785_s17 + $0x8] sm:$0xf] }
 0x28e   : > { %v1732_v47 = vsel %vm1414_vm4, %v1723_v35, 0.0  ;;  %v1657_v49 = vadd.f32 %v1656_v33, %v1655_v59  ;;  %v1861_v54 = vrot.slane %v1859_v43, 4  ;;  %v1860_v56 = vrot.slane %v1857_v44, 4 }
 0x28f   : > { %2253 = vst.msk [vmem:[%s2800_s24 + $0x2] ss:$8 sm:$0x7] %vm3078_vm9, %v1623_v39  ;;  %v1664_v50 = vadd.f32 %v1663_v41, %v1662_v31  ;;  %v1733_v51 = vrot.slane %v1732_v47, 4  ;;  %v1727_v11 = vadd.f32 %v1726_v46, %v1725_v36  ;;  %v1816_v15 = vrot.slane %v1815_v48, 2 }
 0x290   : > { %v1797_v57 = vcombine.high %v1794_v52, %v1794_v52  ;;  %v1799_v58 = vsel %vm1414_vm4, %v1794_v52, 0.0  ;;  %v1689_v60 = vrot.slane %v1671_v45, %v3063_v19  ;;  %v1865_v63 = vsel %vm1863_vm11, %v1859_v43, %v1861_v54 }
 0x291   : > { %v1675_v34 = vcombine.low %v1657_v49, %v1664_v50  ;;  %v1734_v40 = vadd.f32 %v1733_v51, %v1732_v47  ;;  %v1728_v61 = vrot.slane %v1727_v11, 2  ;;  %v1800_v62 = vrot.slane %v1799_v58, 4 }
 0x292   : > { %v1806_v4 = vsel %vm1414_vm4, %v1797_v57, 0.0  ;;  %v1869_v5 = vmul.f32 %v1865_v63, %v1851_v53  ;;  %v1817_v8 = vadd.f32 %v1816_v15, %v1815_v48  ;;  %v1862_v17 = vsel %vm1414_vm4, %v1860_v56, %v1861_v54 }
 0x293   : > { %v1682_v0 = vrot.slane %v1675_v34, %v3063_v19  ;;  %v1735_v3 = vrot.slane %v1734_v40, 2  ;;  %v1729_v6 = vadd.f32 %v1728_v61, %v1727_v11  ;;  %v1801_v9 = vadd.f32 %v1800_v62, %v1799_v58 }
 0x294   : > { %v1807_v12 = vrot.slane %v1806_v4, 4  ;;  %v1887_v16 = vsel %vm1414_vm4, %v1869_v5, 0.0  ;;  %v1745_v18 = vadd.f32 %v1744_v42, %v1743_v1  ;;  %v1864_v25 = vsel %vm1863_vm11, %v1857_v44, %v1862_v17 }
 0x295   : > { %v1690_v13 = vcombine.low %v1682_v0, %v1689_v60  ;;  %v1736_v14 = vadd.f32 %v1735_v3, %v1734_v40  ;;  %v1730_v20 = vrot.slane %v1729_v6, 1  ;;  %v1802_v21 = vrot.slane %v1801_v9, 2 }
 0x296   : > { %v1808_v7 = vadd.f32 %v1807_v12, %v1806_v4  ;;  %v1888_v24 = vrot.slane %v1887_v16, 4  ;;  %v1818_v27 = vrot.slane %v1817_v8, 1  ;;  %v1868_v32 = vmul.f32 %v1864_v25, %v3053_v2 }
 0x297   : > { %v1697_v23 = vrot.slane %v1690_v13, %v3063_v19  ;;  %v1737_v55 = vrot.slane %v1736_v14, 1  ;;  %v1731_v59 = vadd.f32 %v1730_v20, %v1729_v6  ;;  %v1803_v28 = vadd.f32 %v1802_v21, %v1801_v9 }
 0x298   : > { %v1809_v29 = vrot.slane %v1808_v7, 2  ;;  %v1889_v30 = vadd.f32 %v1888_v24, %v1887_v16  ;;  %v1935_v33 = vrot.slane %v1933_v22, 4  ;;  %v1763_v31 = vrot.slane %v1745_v18, %v3063_v19 }
 0x299   : > { %2254 = vst.msk [vmem:[%s2800_s24 + $0x3] ss:$8 sm:$0x7] %vm3078_vm9, %v1697_v23  ;;  %v1738_v1 = vadd.f32 %v1737_v55, %v1736_v14  ;;  %v1804_v35 = vrot.slane %v1803_v28, 1  ;;  %v1934_v38 = vrot.slane %v1931_v26, 4  ;;  %v1871_v42 = vcombine.high %v1868_v32, %v1868_v32 }
 0x29a   : > { %v1810_v36 = vadd.f32 %v1809_v29, %v1808_v7  ;;  %v1890_v41 = vrot.slane %v1889_v30, 2  ;;  %v1873_v43 = vsel %vm1414_vm4, %v1868_v32, 0.0  ;;  %v1819_v44 = vadd.f32 %v1818_v27, %v1817_v8 }
 0x29b   : > { %v1749_v39 = vcombine.low %v1731_v59, %v1738_v1  ;;  %v1874_v46 = vrot.slane %v1873_v43, 4  ;;  %v1939_v47 = vsel %vm1937_vm12, %v1933_v22, %v1935_v33  ;;  %v1805_v49 = vadd.f32 %v1804_v35, %v1803_v28 }
 0x29c   : > { %v1811_v45 = vrot.slane %v1810_v36, 1  ;;  %v1880_v50 = vsel %vm1414_vm4, %v1871_v42, 0.0  ;;  %v1943_v51 = vmul.f32 %v1939_v47, %v1925_v37  ;;  %v1936_v53 = vsel %vm1414_vm4, %v1934_v38, %v1935_v33 }
 0x29d   : > { %v1756_v48 = vrot.slane %v1749_v39, %v3063_v19  ;;  %v1875_v11 = vadd.f32 %v1874_v46, %v1873_v43  ;;  %v1881_v15 = vrot.slane %v1880_v50, 4  ;;  %v1891_v56 = vadd.f32 %v1890_v41, %v1889_v30 }
 0x29e   : > { %v1812_v52 = vadd.f32 %v1811_v45, %v1810_v36  ;;  %v1961_v34 = vsel %vm1414_vm4, %v1943_v51, 0.0  ;;  %v1938_v40 = vsel %vm1937_vm12, %v1931_v26, %v1936_v53  ;;  %v1837_v63 = vrot.slane %v1819_v44, %v3063_v19 }
 0x29f   : > { %v1764_v54 = vcombine.low %v1756_v48, %v1763_v31  ;;  %v1876_v58 = vrot.slane %v1875_v11, 2  ;;  %v1882_v60 = vadd.f32 %v1881_v15, %v1880_v50  ;;  %v1962_v61 = vrot.slane %v1961_v34, 4 }
 0x2a0   : > { %v1823_v57 = vcombine.low %v1805_v49, %v1812_v52  ;;  %v1942_v0 = vmul.f32 %v1938_v40, %v3053_v2  ;;  %v1892_v13 = vrot.slane %v1891_v56, 1 }
 0x2a1   : > { %v1771_v62 = vrot.slane %v1764_v54, %v3063_v19  ;;  %v1877_v4 = vadd.f32 %v1876_v58, %v1875_v11  ;;  %v1883_v5 = vrot.slane %v1882_v60, 2  ;;  %v1963_v6 = vadd.f32 %v1962_v61, %v1961_v34 }
 0x2a2   : > { %v1830_v3 = vrot.slane %v1823_v57, %v3063_v19  ;;  %v1945_v8 = vcombine.high %v1942_v0, %v1942_v0  ;;  %v1947_v9 = vsel %vm1414_vm4, %v1942_v0, 0.0  ;;  %v1893_v23 = vadd.f32 %v1892_v13, %v1891_v56 }
 0x2a3   : > { %2255 = vst.msk [vmem:[%s2800_s24 + $0x4] ss:$8 sm:$0x7] %vm3078_vm9, %v1771_v62  ;;  %v1878_v14 = vrot.slane %v1877_v4, 1  ;;  %v1884_v16 = vadd.f32 %v1883_v5, %v1882_v60  ;;  %v1964_v17 = vrot.slane %v1963_v6, 2  ;;  %v1948_v18 = vrot.slane %v1947_v9, 4 }
 0x2a4   : > { %v1838_v12 = vcombine.low %v1830_v3, %v1837_v63  ;;  %v1954_v2 = vsel %vm1414_vm4, %v1945_v8, 0.0  ;;  %v1911_v1 = vrot.slane %v1893_v23, %v3063_v19 }
 0x2a5   : > { %v1885_v21 = vrot.slane %v1884_v16, 1  ;;  %v1949_v7 = vadd.f32 %v1948_v18, %v1947_v9  ;;  %v1955_v22 = vrot.slane %v1954_v2, 4  ;;  %v1879_v55 = vadd.f32 %v1878_v14, %v1877_v4 }
 0x2a6   : > { %v1845_v20 = vrot.slane %v1838_v12, %v3063_v19  ;;  %v1965_v25 = vadd.f32 %v1964_v17, %v1963_v6 }
 0x2a7   : > { %v1886_v24 = vadd.f32 %v1885_v21, %v1884_v16  ;;  %v1950_v26 = vrot.slane %v1949_v7, 2  ;;  %v1956_v59 = vadd.f32 %v1955_v22, %v1954_v2 }
 0x2a8   : > { %2256 = vst.msk [vmem:[%s2800_s24 + $0x5] ss:$8 sm:$0x7] %vm3078_vm9, %v1845_v20  ;;  %v1966_v32 = vrot.slane %v1965_v25, 1 }
 0x2a9   : > { %v1897_v27 = vcombine.low %v1879_v55, %v1886_v24  ;;  %v1951_v28 = vadd.f32 %v1950_v26, %v1949_v7  ;;  %v1957_v29 = vrot.slane %v1956_v59, 2 }
 0x2aa   : > { %v1967_v38 = vadd.f32 %v1966_v32, %v1965_v25 }
 0x2ab   : > { %v1904_v30 = vrot.slane %v1897_v27, %v3063_v19  ;;  %v1952_v33 = vrot.slane %v1951_v28, 1  ;;  %v1958_v31 = vadd.f32 %v1957_v29, %v1956_v59 }
 0x2ac   : > { %v1985_v43 = vrot.slane %v1967_v38, %v3063_v19 }
 0x2ad   : > { %v1912_v35 = vcombine.low %v1904_v30, %v1911_v1  ;;  %v1959_v36 = vrot.slane %v1958_v31, 1  ;;  %v1953_v39 = vadd.f32 %v1952_v33, %v1951_v28 }
 0x2af   : > { %v1919_v37 = vrot.slane %v1912_v35, %v3063_v19  ;;  %v1960_v41 = vadd.f32 %v1959_v36, %v1958_v31 }
 0x2b1   : > { %2257 = vst.msk [vmem:[%s2800_s24 + $0x6] ss:$8 sm:$0x7] %vm3078_vm9, %v1919_v37  ;;  %v1971_v42 = vcombine.low %v1953_v39, %v1960_v41 }
 0x2b3   : > { %v1978_v44 = vrot.slane %v1971_v42, %v3063_v19 }
 0x2b5   : > { %v1986_v45 = vcombine.low %v1978_v44, %v1985_v43 }
 0x2b7   : > { %v1993_v46 = vrot.slane %v1986_v45, %v3063_v19 }
 0x2b9   : > { %2258 = vst.msk [vmem:[%s2800_s24 + $0x7] ss:$8 sm:$0x7] %vm3078_vm9, %v1993_v46 }
 0x2ba PF: > { %p2259_p1 = scmp.ne.s32.totalorder %s2577_s15, 3 }
 0x2bb   : > { %s2623_s23 = smov (!%p2259_p1), 44  }
 0x2bc   : > { %2001 = sbr.rel (%p2259_p1) target bundleno = 855 (0x357), region = 52 }
 0x2c1   : > { %v2004_v47 = vld [vmem:[%s2791_s20] sm:$0xff]  ;;  %v2054_v48 = vlaneseq  ;;  %v2005_v19 = vld [vmem:[%s2791_s20 + $0x8] sm:$0xff]  ;;  %v2624_v49 = vmov 0.0   ;;  %vm2014_vm14 = vcmask 1043456   ;;  %vm2016_vm15 = vcmask 359424  }
 0x2c2   : > { %2008 = vrot.lane.b32.xlu0 %v2004_v47, %s2623_s23  ;;  %v2003_v11 = vld [vmem:[%s2785_s17 + $0x8] sm:$0xf]  ;;  %v2002_v53 = vld [vmem:[%s2785_s17] sm:$0xff]  ;;  %v2625_v8 = vmov 1966171168  }
 0x2c3   : > { %vm3175_vm13 = vcmp.lt.s32.totalorder %v2054_v48, 384  ;;  %v2052_v9 = vunpack.c.l.s4 %v2625_v8  ;;  %v2055_v18 = vshrl.u32 %v2054_v48, 7 }
 0x2c4   : > { %2260 = vst.msk [vmem:[%s2800_s24 + $0x1] ss:$8 sm:$0x7] %vm3175_vm13, %v2624_v49  ;;  %2261 = vst.msk [vmem:[%s2800_s24 + $0x2] ss:$8 sm:$0x7] %vm3175_vm13, %v2624_v49 }
 0x2c5   : > { %2262 = vst.msk [vmem:[%s2800_s24 + $0x3] ss:$8 sm:$0x7] %vm3175_vm13, %v2624_v49  ;;  %2263 = vst.msk [vmem:[%s2800_s24 + $0x4] ss:$8 sm:$0x7] %vm3175_vm13, %v2624_v49  ;;  %v2053_v2 = vunpack.c.0.s8 %v2052_v9 }
 0x2c6   : > { %2264 = vst.msk [vmem:[%s2800_s24 + $0x5] ss:$8 sm:$0x7] %vm3175_vm13, %v2624_v49  ;;  %2265 = vst.msk [vmem:[%s2800_s24 + $0x6] ss:$8 sm:$0x7] %vm3175_vm13, %v2624_v49  ;;  %2010 = vrot.lane.b32.xlu0 %v2005_v19, %s2623_s23 }
 0x2c7   : > { %2266 = vst.msk [vmem:[%s2800_s24 + $0x7] ss:$8 sm:$0x7] %vm3175_vm13, %v2624_v49  ;;  %v2056_v23 = vsub.s32 %v2053_v2, %v2055_v18 }
 0x334   : > { %v2009_v50 = vpop.permute.xlu0 %2008 }
 0x335   : > { %v2012_v52 = vrot.slane %v2009_v50, 4 }
 0x338   : > { %v2011_v51 = vpop.permute.xlu0 %2010 }
 0x339   : > { %v2013_v15 = vrot.slane %v2011_v51, 4 }
 0x33b   : > { %v2015_v54 = vsel %vm2014_vm14, %v2012_v52, %v2013_v15  ;;  %v2018_v56 = vsel %vm2016_vm15, %v2011_v51, %v2013_v15 }
 0x33c   : > { %v2017_v34 = vsel %vm2016_vm15, %v2009_v50, %v2015_v54  ;;  %v2022_v40 = vmul.f32 %v2018_v56, %v2003_v11 }
 0x33d   : > { %v2021_v57 = vmul.f32 %v2017_v34, %v2002_v53 }
 0x33e   : > { %v2040_v58 = vsel %vm2014_vm14, %v2022_v40, 0.0 }
 0x33f   : > { %v2024_v60 = vcombine.high %v2021_v57, %v2021_v57  ;;  %v2026_v61 = vsel %vm2014_vm14, %v2021_v57, 0.0  ;;  %v2041_v62 = vrot.slane %v2040_v58, 4 }
 0x340   : > { %v2027_v63 = vrot.slane %v2026_v61, 4 }
 0x341   : > { %v2033_v0 = vsel %vm2014_vm14, %v2024_v60, 0.0  ;;  %v2042_v3 = vadd.f32 %v2041_v62, %v2040_v58 }
 0x342   : > { %v2028_v4 = vadd.f32 %v2027_v63, %v2026_v61  ;;  %v2034_v5 = vrot.slane %v2033_v0, 4 }
 0x343   : > { %v2043_v6 = vrot.slane %v2042_v3, 2 }
 0x344   : > { %v2029_v12 = vrot.slane %v2028_v4, 2  ;;  %v2035_v13 = vadd.f32 %v2034_v5, %v2033_v0 }
 0x345   : > { %v2044_v14 = vadd.f32 %v2043_v6, %v2042_v3 }
 0x346   : > { %v2030_v16 = vadd.f32 %v2029_v12, %v2028_v4  ;;  %v2036_v17 = vrot.slane %v2035_v13, 2 }
 0x347   : > { %v2045_v7 = vrot.slane %v2044_v14, 1 }
 0x348   : > { %v2031_v20 = vrot.slane %v2030_v16, 1  ;;  %v2037_v21 = vadd.f32 %v2036_v17, %v2035_v13 }
 0x349   : > { %v2046_v25 = vadd.f32 %v2045_v7, %v2044_v14 }
 0x34a   : > { %v2038_v22 = vrot.slane %v2037_v21, 1  ;;  %v2032_v55 = vadd.f32 %v2031_v20, %v2030_v16 }
 0x34b   : > { %v2064_v27 = vrot.slane %v2046_v25, %v2056_v23 }
 0x34c   : > { %v2039_v24 = vadd.f32 %v2038_v22, %v2037_v21 }
 0x34e   : > { %v2050_v26 = vcombine.low %v2032_v55, %v2039_v24 }
 0x350   : > { %v2057_v59 = vrot.slane %v2050_v26, %v2056_v23 }
 0x352   : > { %v2065_v28 = vcombine.low %v2057_v59, %v2064_v27 }
 0x354   : > { %v2072_v29 = vrot.slane %v2065_v28, %v2056_v23 }
 0x356   : > { %2078 = vst.msk [vmem:[%s2800_s24] ss:$8 sm:$0x7] %vm3175_vm13, %v2072_v29 }
 0x357 PF: > { %s2275_s17 = smul.u32 3, %s2577_s15  ;;  %s2118_s28 = sshll.u32 %s2800_s24, 4  ;;  %s2119_s28 = int_to_ptr.vmem [resolvable:$true] %s2118_s28 }
 0x358   : > { %s2276_s20 = smul.u32 12, %s2581_s16  ;;  %s2102_s7 = scalar_lea.sflag [#allocation4], %s209_s21 }
 0x359   : > { %s2469_s8 = scalar_lea.vmem %s2119_s28, 384  ;;  %s2626_s12 = smov [#allocation7]  }
 0x35a   : > { %s2114_s27 = sadd.s32 %s2276_s20, %s2275_s17  ;;  %p2470_p8 = scmp.ne.s32.totalorder %s2119_s28, %s2469_s8 }
 0x35b   : > { %s2267_s25 = sshll.u32 %s2114_s27, 7  ;;  %s2473_s0 = sshll.u32 %s2626_s12, 4  ;;  %s2474_s0 = int_to_ptr.vmem [resolvable:$false] %s2473_s0 }
 0x35c   : > { %s2116_s30 = scalar_lea.hbm %s3268_s2, %s2267_s25  ;;  %p2471_p3 = pnand %p2470_p8, %p2724_p12 }
 0x35d   : > { %s2475_s15 = scalar_lea.vmem %s2474_s0, 768  ;;  %p2476_p10 = scmp.lt.s32.totalorder %s2119_s28, %s2474_s0 }
 0x35e   : > { %p2472_p9 = pneg %p2471_p3  ;;  %p2477_p5 = scmp.lt.s32.totalorder %s2475_s15, %s2469_s8 }
 0x360   : > { %p2478_p11 = por %p2477_p5, %p2476_p10 }
 0x362   : > { %p2479_p13 = pnand %p2478_p11, %p2472_p9 }
 0x364   : > { %2482 = shalt.err (!%p2479_p13)
}
 0x365   : > { %s2483_s16 = scalar_lea.hbm %s2116_s30, 384  ;;  %s2487_s22 = scalar_lea.hbm %s3268_s2, 3072 }
 0x366   : > { %p2484_p0 = scmp.ne.s32.totalorder %s2116_s30, %s2483_s16  ;;  %p2488_p6 = scmp.lt.s32.totalorder %s2116_s30, %s3268_s2 }
 0x367   : > { %p2489_p1 = scmp.lt.s32.totalorder %s2487_s22, %s2483_s16 }
 0x368   : > { %p2485_p4 = pnand %p2484_p0, %p2724_p12 }
 0x369   : > { %p2490_p8 = por %p2489_p1, %p2488_p6 }
 0x36a   : > { %p2486_p7 = pneg %p2485_p4 }
 0x36c   : > { %p2491_p3 = pnand %p2490_p8, %p2486_p7 }
 0x36e   : > { %2494 = shalt.err (!%p2491_p3)
}
 0x36f   : > { %2281 = dma.vmem_to_hbm [thread:$0]  (%p2724_p12), %s2119_s28, 384, %s2116_s30, %s2102_s7  }
 0x370 PF: > { %p2295_p9 = scmp.ge.s32.totalorder %s2593_s19, 2  ;;  %s2130_s20 = sand.u32 1, %s2553_s9  }
 0x371   : > { %s2131_s27 = scalar_lea.sflag [#allocation4], %s2130_s20 }
 0x372   : > { %p2291_p10 = pnand %p2295_p9, %p2737_p2 }
 0x374   : > { %p2292_p5 = pneg %p2291_p10 }
 0x376   : > { %2548 = dma.done.wait (%p2292_p5), %s2131_s27, 384  }
 0x377   : > { %2550 = vsyncadd (%p2292_p5), %s2131_s27, 4294966912  ;;  %s21_s19 = sadd.s32 1, %s2593_s19   ;;  %s3291_s15 = sld [smem:[#allocation11_spill]] }
 0x378   : > { %p18_p11 = scmp.ge.s32.totalorder %s21_s19, 10   ;;  %s3292_s17 = sld [smem:[#allocation12_spill]] }
 0x379   : > { %s3293_s3 = sld [smem:[#allocation13_spill]]  ;;  %s3294_s9 = smov %s2557_s10 }
 0x37a   : > { %s3295_s10 = smov %s2561_s11  ;;  %s3296_s11 = smov %s2732_s5 }
 0x37b   : > { %s3297_s12 = smov %s2569_s13  ;;  %s3298_s13 = smov %s2573_s14 }
 0x37c   : > { %s3299_s14 = smov %s2729_s4  ;;  %s3300_s16 = smov %s2589_s18 }
 0x37d   :  { %20 = sbr.rel (!%p18_p11) target bundleno = 13 (0xd), region = 130 }
 0x37f   : > { %s3301_s18 = smov %s3293_s3 }
 0x382   :  { %2136 = vsyncpa [#allocation3], 1 }
 0x383   :  { %2138 = vsyncpa [#allocation3 + $0x1], 1 }
 0x384   :  { %2139 = vsyncpa [#allocation6], 1 }
 0x385   :  { %2141 = vsyncpa [#allocation6 + $0x1], 1 }
 0x386   :  { %2142 = vsyncpa [#allocation4], 1 }
 0x387   :  { %2144 = vsyncpa [#allocation4 + $0x1], 1 }

</bundles_post_ra>
